<compile_context>
chip_gen: v6e
topology: v6e:2x2x1
jax: 0.10.0
libtpu: 0.0.40
codegen_flags: <defaults>
</compile_context>

<pallas_src>
import functools

import jax
import jax.numpy as jnp
from jax.experimental import pallas as pl
from jax.experimental.pallas import tpu as pltpu


def _round_up(x, m):
    return (x + m - 1) // m * m


def make_decoder_kernel(T, feat_nb, hidden_size, output_size, rows):
    H = hidden_size
    O = output_size
    O2, O3, O6, O9 = 2 * O, 3 * O, 6 * O, 9 * O
    r_wlin, r_wih0, r_whh, r_blin, r_bih0, r_bfuse = rows

    def kernel(ht_ref, enc_ref, slab_ref, out_ref):
        B = ht_ref.shape[0]

        # ---- unpack packed weight/bias slab (static, sublane-aligned slices) ----
        wlin = slab_ref[r_wlin:r_wlin + feat_nb, 0:H]          # (feat_nb, H)
        wih0 = slab_ref[r_wih0:r_wih0 + H, 0:O3]               # (H, 3O)
        whhf = slab_ref[r_whh:r_whh + O2, 0:O9]                # (2O, 9O) fused RHS
        blin = slab_ref[r_blin:r_blin + 1, 0:H]                # (1, H)
        bih0 = slab_ref[r_bih0:r_bih0 + 1, 0:O3]               # (1, 3O)
        bfuse = slab_ref[r_bfuse:r_bfuse + 1, 0:O9]            # (1, 9O) [bhh0|bih1|bhh1]

        # ---- Linear + ReLU on the flattened hidden state ----
        h_lin = jnp.dot(ht_ref[...], wlin,
                        preferred_element_type=jnp.float32) + blin
        h_lin = jnp.maximum(h_lin, 0.0)                        # (B, H)

        # ---- mask: positives -> 1, sum over features, clamp sums >= 1 to 1 ----
        enc = enc_ref[...]                                     # (B, T, F)
        m = jnp.where(enc > 0.0, jnp.float32(1.0), enc)
        s = jnp.sum(m, axis=2)                                 # (B, T)
        mask = jnp.where(s >= 1.0, jnp.float32(1.0), s)        # (B, T)

        # ---- hoisted layer-0 gate precompute for ALL timesteps (off the chain) ----
        gi0_base = jnp.dot(h_lin, wih0,
                           preferred_element_type=jnp.float32)          # (B, 3O)
        maskT = mask.T                                                   # (T, B)
        gi0_all = maskT[:, :, None] * gi0_base[None, :, :] + bih0        # (T, B, 3O)

        # ---- recurrence: one fused MXU matmul per step ----
        h0 = jnp.zeros((B, O), jnp.float32)
        h1 = jnp.zeros((B, O), jnp.float32)
        # gh0 carried for current step: h0_{-1} = 0  ->  gh0_0 = bhh0
        gh0 = jnp.broadcast_to(bfuse[:, 0:O3], (B, O3))

        outs = []
        for t in range(T):
            # reversed-time masked layer-0 input gates (precomputed, incl. bih0)
            gi0 = gi0_all[T - 1 - t]                           # (B, 3O)

            # layer 0 (PyTorch gate order r, z, n); r/z sigmoids batched
            rz0 = jax.nn.sigmoid(gi0[:, 0:O2] + gh0[:, 0:O2])
            r0 = rz0[:, 0:O]
            z0 = rz0[:, O:O2]
            n0 = jnp.tanh(gi0[:, O2:O3] + r0 * gh0[:, O2:O3])
            h0 = (1.0 - z0) * n0 + z0 * h0

            # single fused matmul: [gh0_{t+1} | gi1_t | gh1_t]
            lhs = jnp.concatenate([h0, h1], axis=1)            # (B, 2O)
            g = jnp.dot(lhs, whhf,
                        preferred_element_type=jnp.float32) + bfuse     # (B, 9O)
            gh0 = g[:, 0:O3]                                   # carried to step t+1
            gi1 = g[:, O3:O6]
            gh1 = g[:, O6:O9]

            # layer 1
            rz1 = jax.nn.sigmoid(gi1[:, 0:O2] + gh1[:, 0:O2])
            r1 = rz1[:, 0:O]
            z1 = rz1[:, O:O2]
            n1 = jnp.tanh(gi1[:, O2:O3] + r1 * gh1[:, O2:O3])
            h1 = (1.0 - z1) * n1 + z1 * h1

            outs.append(h1)

        # one unmasked, lane-dense store (B, T*O)
        out_ref[...] = jnp.concatenate(outs, axis=1)

    return kernel


def prepare_decoder_params(params):
    """One-time weight layout prep: transposes, block fusion, single packed slab."""
    H, feat_nb = params["wlin"].shape          # wlin: (H, feat_nb)
    O = params["whh0"].shape[1]                # whh0: (3O, O)
    O2, O3, O9 = 2 * O, 3 * O, 9 * O

    f32 = lambda a: jnp.asarray(a, jnp.float32)

    # Fused per-step RHS for LHS = [h0_t | h1_{t-1}] (B, 2O):
    #   cols 0:3O   -> gh0_{t+1} = h0_t     @ Whh0^T
    #   cols 3O:6O  -> gi1_t     = h0_t     @ Wih1^T
    #   cols 6O:9O  -> gh1_t     = h1_{t-1} @ Whh1^T
    whhf = jnp.zeros((O2, O9), jnp.float32)
    whhf = whhf.at[0:O, 0:O3].set(f32(params["whh0"]).T)
    whhf = whhf.at[0:O, O3:2 * O3].set(f32(params["wih1"]).T)
    whhf = whhf.at[O:O2, 2 * O3:O9].set(f32(params["whh1"]).T)
    bfuse = jnp.concatenate(
        [f32(params["bhh0"]), f32(params["bih1"]), f32(params["bhh1"])])  # (9O,)

    # 8-row-aligned offsets inside one packed slab
    r_wlin = 0
    r_wih0 = r_wlin + _round_up(feat_nb, 8)
    r_whh = r_wih0 + _round_up(H, 8)
    r_blin = r_whh + _round_up(O2, 8)
    r_bih0 = r_blin + 8
    r_bfuse = r_bih0 + 8
    n_rows = _round_up(r_bfuse + 1, 8)
    n_cols = max(H, O3, O9)

    slab = jnp.zeros((n_rows, n_cols), jnp.float32)
    slab = slab.at[r_wlin:r_wlin + feat_nb, 0:H].set(f32(params["wlin"]).T)
    slab = slab.at[r_wih0:r_wih0 + H, 0:O3].set(f32(params["wih0"]).T)
    slab = slab.at[r_whh:r_whh + O2, 0:O9].set(whhf)
    slab = slab.at[r_blin, 0:H].set(f32(params["blin"]))
    slab = slab.at[r_bih0, 0:O3].set(f32(params["bih0"]))
    slab = slab.at[r_bfuse, 0:O9].set(bfuse)

    rows = (r_wlin, r_wih0, r_whh, r_blin, r_bih0, r_bfuse)
    config = (feat_nb, H, O, rows)
    return slab, config


@functools.partial(jax.jit, static_argnames=("config",))
def decoder_forward(encoded, ht_flatten, encoder_input, slab, config):
    feat_nb, hidden_size, output_size, rows = config
    B, T, _ = encoded.shape
    O = output_size

    kernel = make_decoder_kernel(T, feat_nb, hidden_size, O, rows)
    vmem = pl.BlockSpec(memory_space=pltpu.MemorySpace.VMEM)

    out_flat = pl.pallas_call(
        kernel,
        out_shape=jax.ShapeDtypeStruct((B, T * O), jnp.float32),
        in_specs=[vmem, vmem, vmem],
        out_specs=vmem,
    )(ht_flatten.astype(jnp.float32), encoder_input.astype(jnp.float32), slab)
    return out_flat.reshape(B, T, O)                           # free reshape


def decoder_reference(encoded, ht_flatten, encoder_input, params):
    """Pure-JAX reference of the PyTorch forward (eval mode)."""
    O = params["whh0"].shape[1]
    m = jnp.where(encoder_input > 0.0, 1.0, encoder_input)
    s = jnp.sum(m, axis=2)
    mask = jnp.where(s >= 1.0, 1.0, s)                         # (B, T)
    mask = mask[:, ::-1]                                       # reversed index_select
    h = jax.nn.relu(ht_flatten @ params["wlin"].T + params["blin"])  # (B, H)
    x = h[:, None, :] * mask[:, :, None]                       # (B, T, H)

    def cell(x_t, h_t, wih, whh, bih, bhh):
        gi = x_t @ wih.T + bih
        gh = h_t @ whh.T + bhh
        r = jax.nn.sigmoid(gi[:, :O] + gh[:, :O])
        z = jax.nn.sigmoid(gi[:, O:2 * O] + gh[:, O:2 * O])
        n = jnp.tanh(gi[:, 2 * O:] + r * gh[:, 2 * O:])
        return (1.0 - z) * n + z * h_t

    B, T, _ = x.shape
    h0 = jnp.zeros((B, O)); h1 = jnp.zeros((B, O)); outs = []
    for t in range(T):
        h0 = cell(x[:, t], h0, params["wih0"], params["whh0"],
                  params["bih0"], params["bhh0"])
        h1 = cell(h0, h1, params["wih1"], params["whh1"],
                  params["bih1"], params["bhh1"])
        outs.append(h1)
    return jnp.stack(outs, axis=1)


def make_params(key, feat_nb, hidden_size, output_size):
    ks = jax.random.split(key, 12)

    def u(k, shape, scale=0.2):
        return jax.random.uniform(k, shape, jnp.float32, -scale, scale)

    return {
        "wlin": u(ks[0], (hidden_size, feat_nb)),
        "blin": u(ks[1], (hidden_size,)),
        "wih0": u(ks[2], (3 * output_size, hidden_size)),
        "whh0": u(ks[3], (3 * output_size, output_size)),
        "bih0": u(ks[4], (3 * output_size,)),
        "bhh0": u(ks[5], (3 * output_size,)),
        "wih1": u(ks[6], (3 * output_size, output_size)),
        "whh1": u(ks[7], (3 * output_size, output_size)),
        "bih1": u(ks[8], (3 * output_size,)),
        "bhh1": u(ks[9], (3 * output_size,)),
    }


if __name__ == "__main__":
    B, T = 2, 8
    feat_nb, hidden_size, output_size, f_in, enc_dim = 24, 32, 16, 16, 16

    key = jax.random.PRNGKey(0)
    k1, k2, k3, kp = jax.random.split(key, 4)
    encoded = jax.random.normal(k1, (B, T, enc_dim), jnp.float32)
    ht_flatten = jax.random.normal(k2, (B, feat_nb), jnp.float32)
    encoder_input = jax.random.normal(k3, (B, T, f_in), jnp.float32)
    # make a couple of timesteps all-zero so the mask actually does something
    encoder_input = encoder_input.at[:, -2:, :].set(0.0)

    params = make_params(kp, feat_nb, hidden_size, output_size)
    slab, config = prepare_decoder_params(params)

    out = jax.block_until_ready(
        decoder_forward(encoded, ht_flatten, encoder_input, slab, config))

    ref = decoder_reference(encoded, ht_flatten, encoder_input, params)
    assert out.shape == (B, T, output_size)
    assert bool(jnp.all(jnp.isfinite(out)))
    assert bool(jnp.allclose(out, ref, rtol=1e-3, atol=1e-3)), \
        f"max err {float(jnp.max(jnp.abs(out - ref)))}"
    print("KERNEL_OK")
</pallas_src>

<mosaic_0001>
module attributes {stable_mosaic.version = 11 : i64} {
  func.func @kernel(%arg0: memref<2x24xf32, #tpu.memory_space<vmem>>, %arg1: memref<2x8x16xf32, #tpu.memory_space<vmem>>, %arg2: memref<112x144xf32, #tpu.memory_space<vmem>>, %arg3: memref<2x128xf32, #tpu.memory_space<vmem>>) attributes {dimension_semantics = [], scalar_prefetch = 0 : i64, scratch_operands = 0 : i64, tpu.core_type = #tpu.core_type<tc>} {
    %c0 = arith.constant 0 : index
    %c0_0 = arith.constant 0 : index
    %0 = vector.load %arg2[%c0, %c0_0] : memref<112x144xf32, #tpu.memory_space<vmem>>, vector<24x32xf32>
    %c24 = arith.constant 24 : index
    %c0_1 = arith.constant 0 : index
    %1 = vector.load %arg2[%c24, %c0_1] : memref<112x144xf32, #tpu.memory_space<vmem>>, vector<32x48xf32>
    %c56 = arith.constant 56 : index
    %c0_2 = arith.constant 0 : index
    %2 = vector.load %arg2[%c56, %c0_2] : memref<112x144xf32, #tpu.memory_space<vmem>>, vector<32x144xf32>
    %c88 = arith.constant 88 : index
    %c0_3 = arith.constant 0 : index
    %3 = vector.load %arg2[%c88, %c0_3] : memref<112x144xf32, #tpu.memory_space<vmem>>, vector<1x32xf32>
    %c96 = arith.constant 96 : index
    %c0_4 = arith.constant 0 : index
    %4 = vector.load %arg2[%c96, %c0_4] : memref<112x144xf32, #tpu.memory_space<vmem>>, vector<1x48xf32>
    %c104 = arith.constant 104 : index
    %c0_5 = arith.constant 0 : index
    %5 = vector.load %arg2[%c104, %c0_5] : memref<112x144xf32, #tpu.memory_space<vmem>>, vector<1x144xf32>
    %c0_6 = arith.constant 0 : index
    %c0_7 = arith.constant 0 : index
    %6 = vector.load %arg0[%c0_6, %c0_7] : memref<2x24xf32, #tpu.memory_space<vmem>>, vector<2x24xf32>
    %cst = arith.constant dense<0.000000e+00> : vector<2x32xf32>
    %7 = tpu.matmul %6, %0, %cst {dimension_numbers = #tpu.dot_dimension_numbers<[1], [0], [0], [1], [0, 0, 1, 1], [], []>} : vector<2x24xf32>, vector<24x32xf32>, vector<2x32xf32> -> vector<2x32xf32>
    %8 = vector.broadcast %3 : vector<1x32xf32> to vector<2x32xf32>
    %9 = arith.addf %7, %8 : vector<2x32xf32>
    %cst_8 = arith.constant 0.000000e+00 : f32
    %10 = vector.broadcast %cst_8 : f32 to vector<2x32xf32>
    %11 = arith.maximumf %9, %10 : vector<2x32xf32>
    %c0_9 = arith.constant 0 : index
    %c0_10 = arith.constant 0 : index
    %c0_11 = arith.constant 0 : index
    %12 = vector.load %arg1[%c0_9, %c0_10, %c0_11] : memref<2x8x16xf32, #tpu.memory_space<vmem>>, vector<2x8x16xf32>
    %cst_12 = arith.constant 0.000000e+00 : f32
    %13 = vector.broadcast %cst_12 : f32 to vector<2x8x16xf32>
    %14 = arith.cmpf ogt, %12, %13 : vector<2x8x16xf32>
    %cst_13 = arith.constant 1.000000e+00 : f32
    %15 = vector.broadcast %cst_13 : f32 to vector<2x8x16xf32>
    %16 = arith.select %14, %15, %12 : vector<2x8x16xi1>, vector<2x8x16xf32>
    %cst_14 = arith.constant dense<0.000000e+00> : vector<2x8xf32>
    %17 = vector.multi_reduction <add>, %16, %cst_14 [2] : vector<2x8x16xf32> to vector<2x8xf32>
    %cst_15 = arith.constant 1.000000e+00 : f32
    %18 = vector.broadcast %cst_15 : f32 to vector<2x8xf32>
    %19 = arith.cmpf oge, %17, %18 : vector<2x8xf32>
    %cst_16 = arith.constant 1.000000e+00 : f32
    %20 = vector.broadcast %cst_16 : f32 to vector<2x8xf32>
    %21 = arith.select %19, %20, %17 : vector<2x8xi1>, vector<2x8xf32>
    %cst_17 = arith.constant dense<0.000000e+00> : vector<2x48xf32>
    %22 = tpu.matmul %11, %1, %cst_17 {dimension_numbers = #tpu.dot_dimension_numbers<[1], [0], [0], [1], [0, 0, 1, 1], [], []>} : vector<2x32xf32>, vector<32x48xf32>, vector<2x48xf32> -> vector<2x48xf32>
    %23 = tpu.transpose %21, [1, 0] : vector<2x8xf32> -> vector<8x2xf32>
    %24 = vector.shape_cast %23 : vector<8x2xf32> to vector<8x2x1xf32>
    %25 = vector.shape_cast %22 : vector<2x48xf32> to vector<1x2x48xf32>
    %26 = vector.broadcast %24 : vector<8x2x1xf32> to vector<8x2x48xf32>
    %27 = vector.broadcast %25 : vector<1x2x48xf32> to vector<8x2x48xf32>
    %28 = arith.mulf %26, %27 : vector<8x2x48xf32>
    %29 = vector.shape_cast %4 : vector<1x48xf32> to vector<1x1x48xf32>
    %30 = vector.broadcast %29 : vector<1x1x48xf32> to vector<8x2x48xf32>
    %31 = arith.addf %28, %30 : vector<8x2x48xf32>
    %cst_18 = arith.constant 0.000000e+00 : f32
    %32 = vector.broadcast %cst_18 : f32 to vector<2x16xf32>
    %cst_19 = arith.constant 0.000000e+00 : f32
    %33 = vector.broadcast %cst_19 : f32 to vector<2x16xf32>
    %34 = vector.extract_strided_slice %5 {offsets = [0, 0], sizes = [1, 48], strides = [1, 1]} : vector<1x144xf32> to vector<1x48xf32>
    %35 = vector.shape_cast %34 : vector<1x48xf32> to vector<1x48xf32>
    %36 = vector.broadcast %35 : vector<1x48xf32> to vector<2x48xf32>
    %37 = vector.extract_strided_slice %31 {offsets = [7, 0, 0], sizes = [1, 2, 48], strides = [1, 1, 1]} : vector<8x2x48xf32> to vector<1x2x48xf32>
    %38 = vector.shape_cast %37 : vector<1x2x48xf32> to vector<2x48xf32>
    %39 = vector.extract_strided_slice %38 {offsets = [0, 0], sizes = [2, 32], strides = [1, 1]} : vector<2x48xf32> to vector<2x32xf32>
    %40 = vector.extract_strided_slice %36 {offsets = [0, 0], sizes = [2, 32], strides = [1, 1]} : vector<2x48xf32> to vector<2x32xf32>
    %41 = arith.addf %39, %40 : vector<2x32xf32>
    %42 = arith.negf %41 : vector<2x32xf32>
    %43 = math.exp %42 : vector<2x32xf32>
    %cst_20 = arith.constant 1.000000e+00 : f32
    %44 = vector.broadcast %cst_20 : f32 to vector<2x32xf32>
    %45 = arith.addf %44, %43 : vector<2x32xf32>
    %46 = arith.divf %44, %45 : vector<2x32xf32>
    %47 = vector.extract_strided_slice %46 {offsets = [0, 0], sizes = [2, 16], strides = [1, 1]} : vector<2x32xf32> to vector<2x16xf32>
    %48 = vector.extract_strided_slice %46 {offsets = [0, 16], sizes = [2, 16], strides = [1, 1]} : vector<2x32xf32> to vector<2x16xf32>
    %49 = vector.extract_strided_slice %38 {offsets = [0, 32], sizes = [2, 16], strides = [1, 1]} : vector<2x48xf32> to vector<2x16xf32>
    %50 = vector.extract_strided_slice %36 {offsets = [0, 32], sizes = [2, 16], strides = [1, 1]} : vector<2x48xf32> to vector<2x16xf32>
    %51 = arith.mulf %47, %50 : vector<2x16xf32>
    %52 = arith.addf %49, %51 : vector<2x16xf32>
    %53 = math.tanh %52 : vector<2x16xf32>
    %cst_21 = arith.constant 1.000000e+00 : f32
    %54 = vector.broadcast %cst_21 : f32 to vector<2x16xf32>
    %55 = arith.subf %54, %48 : vector<2x16xf32>
    %56 = arith.mulf %55, %53 : vector<2x16xf32>
    %57 = arith.mulf %48, %32 : vector<2x16xf32>
    %58 = arith.addf %56, %57 : vector<2x16xf32>
    %59 = tpu.concatenate %58, %33 in 1 : vector<2x16xf32>, vector<2x16xf32> -> vector<2x32xf32>
    %cst_22 = arith.constant dense<0.000000e+00> : vector<2x144xf32>
    %60 = tpu.matmul %59, %2, %cst_22 {dimension_numbers = #tpu.dot_dimension_numbers<[1], [0], [0], [1], [0, 0, 1, 1], [], []>} : vector<2x32xf32>, vector<32x144xf32>, vector<2x144xf32> -> vector<2x144xf32>
    %61 = vector.broadcast %5 : vector<1x144xf32> to vector<2x144xf32>
    %62 = arith.addf %60, %61 : vector<2x144xf32>
    %63 = vector.extract_strided_slice %62 {offsets = [0, 0], sizes = [2, 48], strides = [1, 1]} : vector<2x144xf32> to vector<2x48xf32>
    %64 = vector.extract_strided_slice %62 {offsets = [0, 48], sizes = [2, 48], strides = [1, 1]} : vector<2x144xf32> to vector<2x48xf32>
    %65 = vector.extract_strided_slice %62 {offsets = [0, 96], sizes = [2, 48], strides = [1, 1]} : vector<2x144xf32> to vector<2x48xf32>
    %66 = vector.extract_strided_slice %64 {offsets = [0, 0], sizes = [2, 32], strides = [1, 1]} : vector<2x48xf32> to vector<2x32xf32>
    %67 = vector.extract_strided_slice %65 {offsets = [0, 0], sizes = [2, 32], strides = [1, 1]} : vector<2x48xf32> to vector<2x32xf32>
    %68 = arith.addf %66, %67 : vector<2x32xf32>
    %69 = arith.negf %68 : vector<2x32xf32>
    %70 = math.exp %69 : vector<2x32xf32>
    %cst_23 = arith.constant 1.000000e+00 : f32
    %71 = vector.broadcast %cst_23 : f32 to vector<2x32xf32>
    %72 = arith.addf %71, %70 : vector<2x32xf32>
    %73 = arith.divf %71, %72 : vector<2x32xf32>
    %74 = vector.extract_strided_slice %73 {offsets = [0, 0], sizes = [2, 16], strides = [1, 1]} : vector<2x32xf32> to vector<2x16xf32>
    %75 = vector.extract_strided_slice %73 {offsets = [0, 16], sizes = [2, 16], strides = [1, 1]} : vector<2x32xf32> to vector<2x16xf32>
    %76 = vector.extract_strided_slice %64 {offsets = [0, 32], sizes = [2, 16], strides = [1, 1]} : vector<2x48xf32> to vector<2x16xf32>
    %77 = vector.extract_strided_slice %65 {offsets = [0, 32], sizes = [2, 16], strides = [1, 1]} : vector<2x48xf32> to vector<2x16xf32>
    %78 = arith.mulf %74, %77 : vector<2x16xf32>
    %79 = arith.addf %76, %78 : vector<2x16xf32>
    %80 = math.tanh %79 : vector<2x16xf32>
    %cst_24 = arith.constant 1.000000e+00 : f32
    %81 = vector.broadcast %cst_24 : f32 to vector<2x16xf32>
    %82 = arith.subf %81, %75 : vector<2x16xf32>
    %83 = arith.mulf %82, %80 : vector<2x16xf32>
    %84 = arith.mulf %75, %33 : vector<2x16xf32>
    %85 = arith.addf %83, %84 : vector<2x16xf32>
    %86 = vector.extract_strided_slice %31 {offsets = [6, 0, 0], sizes = [1, 2, 48], strides = [1, 1, 1]} : vector<8x2x48xf32> to vector<1x2x48xf32>
    %87 = vector.shape_cast %86 : vector<1x2x48xf32> to vector<2x48xf32>
    %88 = vector.extract_strided_slice %87 {offsets = [0, 0], sizes = [2, 32], strides = [1, 1]} : vector<2x48xf32> to vector<2x32xf32>
    %89 = vector.extract_strided_slice %63 {offsets = [0, 0], sizes = [2, 32], strides = [1, 1]} : vector<2x48xf32> to vector<2x32xf32>
    %90 = arith.addf %88, %89 : vector<2x32xf32>
    %91 = arith.negf %90 : vector<2x32xf32>
    %92 = math.exp %91 : vector<2x32xf32>
    %cst_25 = arith.constant 1.000000e+00 : f32
    %93 = vector.broadcast %cst_25 : f32 to vector<2x32xf32>
    %94 = arith.addf %93, %92 : vector<2x32xf32>
    %95 = arith.divf %93, %94 : vector<2x32xf32>
    %96 = vector.extract_strided_slice %95 {offsets = [0, 0], sizes = [2, 16], strides = [1, 1]} : vector<2x32xf32> to vector<2x16xf32>
    %97 = vector.extract_strided_slice %95 {offsets = [0, 16], sizes = [2, 16], strides = [1, 1]} : vector<2x32xf32> to vector<2x16xf32>
    %98 = vector.extract_strided_slice %87 {offsets = [0, 32], sizes = [2, 16], strides = [1, 1]} : vector<2x48xf32> to vector<2x16xf32>
    %99 = vector.extract_strided_slice %63 {offsets = [0, 32], sizes = [2, 16], strides = [1, 1]} : vector<2x48xf32> to vector<2x16xf32>
    %100 = arith.mulf %96, %99 : vector<2x16xf32>
    %101 = arith.addf %98, %100 : vector<2x16xf32>
    %102 = math.tanh %101 : vector<2x16xf32>
    %cst_26 = arith.constant 1.000000e+00 : f32
    %103 = vector.broadcast %cst_26 : f32 to vector<2x16xf32>
    %104 = arith.subf %103, %97 : vector<2x16xf32>
    %105 = arith.mulf %104, %102 : vector<2x16xf32>
    %106 = arith.mulf %97, %58 : vector<2x16xf32>
    %107 = arith.addf %105, %106 : vector<2x16xf32>
    %108 = tpu.concatenate %107, %85 in 1 : vector<2x16xf32>, vector<2x16xf32> -> vector<2x32xf32>
    %cst_27 = arith.constant dense<0.000000e+00> : vector<2x144xf32>
    %109 = tpu.matmul %108, %2, %cst_27 {dimension_numbers = #tpu.dot_dimension_numbers<[1], [0], [0], [1], [0, 0, 1, 1], [], []>} : vector<2x32xf32>, vector<32x144xf32>, vector<2x144xf32> -> vector<2x144xf32>
    %110 = vector.broadcast %5 : vector<1x144xf32> to vector<2x144xf32>
    %111 = arith.addf %109, %110 : vector<2x144xf32>
    %112 = vector.extract_strided_slice %111 {offsets = [0, 0], sizes = [2, 48], strides = [1, 1]} : vector<2x144xf32> to vector<2x48xf32>
    %113 = vector.extract_strided_slice %111 {offsets = [0, 48], sizes = [2, 48], strides = [1, 1]} : vector<2x144xf32> to vector<2x48xf32>
    %114 = vector.extract_strided_slice %111 {offsets = [0, 96], sizes = [2, 48], strides = [1, 1]} : vector<2x144xf32> to vector<2x48xf32>
    %115 = vector.extract_strided_slice %113 {offsets = [0, 0], sizes = [2, 32], strides = [1, 1]} : vector<2x48xf32> to vector<2x32xf32>
    %116 = vector.extract_strided_slice %114 {offsets = [0, 0], sizes = [2, 32], strides = [1, 1]} : vector<2x48xf32> to vector<2x32xf32>
    %117 = arith.addf %115, %116 : vector<2x32xf32>
    %118 = arith.negf %117 : vector<2x32xf32>
    %119 = math.exp %118 : vector<2x32xf32>
    %cst_28 = arith.constant 1.000000e+00 : f32
    %120 = vector.broadcast %cst_28 : f32 to vector<2x32xf32>
    %121 = arith.addf %120, %119 : vector<2x32xf32>
    %122 = arith.divf %120, %121 : vector<2x32xf32>
    %123 = vector.extract_strided_slice %122 {offsets = [0, 0], sizes = [2, 16], strides = [1, 1]} : vector<2x32xf32> to vector<2x16xf32>
    %124 = vector.extract_strided_slice %122 {offsets = [0, 16], sizes = [2, 16], strides = [1, 1]} : vector<2x32xf32> to vector<2x16xf32>
    %125 = vector.extract_strided_slice %113 {offsets = [0, 32], sizes = [2, 16], strides = [1, 1]} : vector<2x48xf32> to vector<2x16xf32>
    %126 = vector.extract_strided_slice %114 {offsets = [0, 32], sizes = [2, 16], strides = [1, 1]} : vector<2x48xf32> to vector<2x16xf32>
    %127 = arith.mulf %123, %126 : vector<2x16xf32>
    %128 = arith.addf %125, %127 : vector<2x16xf32>
    %129 = math.tanh %128 : vector<2x16xf32>
    %cst_29 = arith.constant 1.000000e+00 : f32
    %130 = vector.broadcast %cst_29 : f32 to vector<2x16xf32>
    %131 = arith.subf %130, %124 : vector<2x16xf32>
    %132 = arith.mulf %131, %129 : vector<2x16xf32>
    %133 = arith.mulf %124, %85 : vector<2x16xf32>
    %134 = arith.addf %132, %133 : vector<2x16xf32>
    %135 = vector.extract_strided_slice %31 {offsets = [5, 0, 0], sizes = [1, 2, 48], strides = [1, 1, 1]} : vector<8x2x48xf32> to vector<1x2x48xf32>
    %136 = vector.shape_cast %135 : vector<1x2x48xf32> to vector<2x48xf32>
    %137 = vector.extract_strided_slice %136 {offsets = [0, 0], sizes = [2, 32], strides = [1, 1]} : vector<2x48xf32> to vector<2x32xf32>
    %138 = vector.extract_strided_slice %112 {offsets = [0, 0], sizes = [2, 32], strides = [1, 1]} : vector<2x48xf32> to vector<2x32xf32>
    %139 = arith.addf %137, %138 : vector<2x32xf32>
    %140 = arith.negf %139 : vector<2x32xf32>
    %141 = math.exp %140 : vector<2x32xf32>
    %cst_30 = arith.constant 1.000000e+00 : f32
    %142 = vector.broadcast %cst_30 : f32 to vector<2x32xf32>
    %143 = arith.addf %142, %141 : vector<2x32xf32>
    %144 = arith.divf %142, %143 : vector<2x32xf32>
    %145 = vector.extract_strided_slice %144 {offsets = [0, 0], sizes = [2, 16], strides = [1, 1]} : vector<2x32xf32> to vector<2x16xf32>
    %146 = vector.extract_strided_slice %144 {offsets = [0, 16], sizes = [2, 16], strides = [1, 1]} : vector<2x32xf32> to vector<2x16xf32>
    %147 = vector.extract_strided_slice %136 {offsets = [0, 32], sizes = [2, 16], strides = [1, 1]} : vector<2x48xf32> to vector<2x16xf32>
    %148 = vector.extract_strided_slice %112 {offsets = [0, 32], sizes = [2, 16], strides = [1, 1]} : vector<2x48xf32> to vector<2x16xf32>
    %149 = arith.mulf %145, %148 : vector<2x16xf32>
    %150 = arith.addf %147, %149 : vector<2x16xf32>
    %151 = math.tanh %150 : vector<2x16xf32>
    %cst_31 = arith.constant 1.000000e+00 : f32
    %152 = vector.broadcast %cst_31 : f32 to vector<2x16xf32>
    %153 = arith.subf %152, %146 : vector<2x16xf32>
    %154 = arith.mulf %153, %151 : vector<2x16xf32>
    %155 = arith.mulf %146, %107 : vector<2x16xf32>
    %156 = arith.addf %154, %155 : vector<2x16xf32>
    %157 = tpu.concatenate %156, %134 in 1 : vector<2x16xf32>, vector<2x16xf32> -> vector<2x32xf32>
    %cst_32 = arith.constant dense<0.000000e+00> : vector<2x144xf32>
    %158 = tpu.matmul %157, %2, %cst_32 {dimension_numbers = #tpu.dot_dimension_numbers<[1], [0], [0], [1], [0, 0, 1, 1], [], []>} : vector<2x32xf32>, vector<32x144xf32>, vector<2x144xf32> -> vector<2x144xf32>
    %159 = vector.broadcast %5 : vector<1x144xf32> to vector<2x144xf32>
    %160 = arith.addf %158, %159 : vector<2x144xf32>
    %161 = vector.extract_strided_slice %160 {offsets = [0, 0], sizes = [2, 48], strides = [1, 1]} : vector<2x144xf32> to vector<2x48xf32>
    %162 = vector.extract_strided_slice %160 {offsets = [0, 48], sizes = [2, 48], strides = [1, 1]} : vector<2x144xf32> to vector<2x48xf32>
    %163 = vector.extract_strided_slice %160 {offsets = [0, 96], sizes = [2, 48], strides = [1, 1]} : vector<2x144xf32> to vector<2x48xf32>
    %164 = vector.extract_strided_slice %162 {offsets = [0, 0], sizes = [2, 32], strides = [1, 1]} : vector<2x48xf32> to vector<2x32xf32>
    %165 = vector.extract_strided_slice %163 {offsets = [0, 0], sizes = [2, 32], strides = [1, 1]} : vector<2x48xf32> to vector<2x32xf32>
    %166 = arith.addf %164, %165 : vector<2x32xf32>
    %167 = arith.negf %166 : vector<2x32xf32>
    %168 = math.exp %167 : vector<2x32xf32>
    %cst_33 = arith.constant 1.000000e+00 : f32
    %169 = vector.broadcast %cst_33 : f32 to vector<2x32xf32>
    %170 = arith.addf %169, %168 : vector<2x32xf32>
    %171 = arith.divf %169, %170 : vector<2x32xf32>
    %172 = vector.extract_strided_slice %171 {offsets = [0, 0], sizes = [2, 16], strides = [1, 1]} : vector<2x32xf32> to vector<2x16xf32>
    %173 = vector.extract_strided_slice %171 {offsets = [0, 16], sizes = [2, 16], strides = [1, 1]} : vector<2x32xf32> to vector<2x16xf32>
    %174 = vector.extract_strided_slice %162 {offsets = [0, 32], sizes = [2, 16], strides = [1, 1]} : vector<2x48xf32> to vector<2x16xf32>
    %175 = vector.extract_strided_slice %163 {offsets = [0, 32], sizes = [2, 16], strides = [1, 1]} : vector<2x48xf32> to vector<2x16xf32>
    %176 = arith.mulf %172, %175 : vector<2x16xf32>
    %177 = arith.addf %174, %176 : vector<2x16xf32>
    %178 = math.tanh %177 : vector<2x16xf32>
    %cst_34 = arith.constant 1.000000e+00 : f32
    %179 = vector.broadcast %cst_34 : f32 to vector<2x16xf32>
    %180 = arith.subf %179, %173 : vector<2x16xf32>
    %181 = arith.mulf %180, %178 : vector<2x16xf32>
    %182 = arith.mulf %173, %134 : vector<2x16xf32>
    %183 = arith.addf %181, %182 : vector<2x16xf32>
    %184 = vector.extract_strided_slice %31 {offsets = [4, 0, 0], sizes = [1, 2, 48], strides = [1, 1, 1]} : vector<8x2x48xf32> to vector<1x2x48xf32>
    %185 = vector.shape_cast %184 : vector<1x2x48xf32> to vector<2x48xf32>
    %186 = vector.extract_strided_slice %185 {offsets = [0, 0], sizes = [2, 32], strides = [1, 1]} : vector<2x48xf32> to vector<2x32xf32>
    %187 = vector.extract_strided_slice %161 {offsets = [0, 0], sizes = [2, 32], strides = [1, 1]} : vector<2x48xf32> to vector<2x32xf32>
    %188 = arith.addf %186, %187 : vector<2x32xf32>
    %189 = arith.negf %188 : vector<2x32xf32>
    %190 = math.exp %189 : vector<2x32xf32>
    %cst_35 = arith.constant 1.000000e+00 : f32
    %191 = vector.broadcast %cst_35 : f32 to vector<2x32xf32>
    %192 = arith.addf %191, %190 : vector<2x32xf32>
    %193 = arith.divf %191, %192 : vector<2x32xf32>
    %194 = vector.extract_strided_slice %193 {offsets = [0, 0], sizes = [2, 16], strides = [1, 1]} : vector<2x32xf32> to vector<2x16xf32>
    %195 = vector.extract_strided_slice %193 {offsets = [0, 16], sizes = [2, 16], strides = [1, 1]} : vector<2x32xf32> to vector<2x16xf32>
    %196 = vector.extract_strided_slice %185 {offsets = [0, 32], sizes = [2, 16], strides = [1, 1]} : vector<2x48xf32> to vector<2x16xf32>
    %197 = vector.extract_strided_slice %161 {offsets = [0, 32], sizes = [2, 16], strides = [1, 1]} : vector<2x48xf32> to vector<2x16xf32>
    %198 = arith.mulf %194, %197 : vector<2x16xf32>
    %199 = arith.addf %196, %198 : vector<2x16xf32>
    %200 = math.tanh %199 : vector<2x16xf32>
    %cst_36 = arith.constant 1.000000e+00 : f32
    %201 = vector.broadcast %cst_36 : f32 to vector<2x16xf32>
    %202 = arith.subf %201, %195 : vector<2x16xf32>
    %203 = arith.mulf %202, %200 : vector<2x16xf32>
    %204 = arith.mulf %195, %156 : vector<2x16xf32>
    %205 = arith.addf %203, %204 : vector<2x16xf32>
    %206 = tpu.concatenate %205, %183 in 1 : vector<2x16xf32>, vector<2x16xf32> -> vector<2x32xf32>
    %cst_37 = arith.constant dense<0.000000e+00> : vector<2x144xf32>
    %207 = tpu.matmul %206, %2, %cst_37 {dimension_numbers = #tpu.dot_dimension_numbers<[1], [0], [0], [1], [0, 0, 1, 1], [], []>} : vector<2x32xf32>, vector<32x144xf32>, vector<2x144xf32> -> vector<2x144xf32>
    %208 = vector.broadcast %5 : vector<1x144xf32> to vector<2x144xf32>
    %209 = arith.addf %207, %208 : vector<2x144xf32>
    %210 = vector.extract_strided_slice %209 {offsets = [0, 0], sizes = [2, 48], strides = [1, 1]} : vector<2x144xf32> to vector<2x48xf32>
    %211 = vector.extract_strided_slice %209 {offsets = [0, 48], sizes = [2, 48], strides = [1, 1]} : vector<2x144xf32> to vector<2x48xf32>
    %212 = vector.extract_strided_slice %209 {offsets = [0, 96], sizes = [2, 48], strides = [1, 1]} : vector<2x144xf32> to vector<2x48xf32>
    %213 = vector.extract_strided_slice %211 {offsets = [0, 0], sizes = [2, 32], strides = [1, 1]} : vector<2x48xf32> to vector<2x32xf32>
    %214 = vector.extract_strided_slice %212 {offsets = [0, 0], sizes = [2, 32], strides = [1, 1]} : vector<2x48xf32> to vector<2x32xf32>
    %215 = arith.addf %213, %214 : vector<2x32xf32>
    %216 = arith.negf %215 : vector<2x32xf32>
    %217 = math.exp %216 : vector<2x32xf32>
    %cst_38 = arith.constant 1.000000e+00 : f32
    %218 = vector.broadcast %cst_38 : f32 to vector<2x32xf32>
    %219 = arith.addf %218, %217 : vector<2x32xf32>
    %220 = arith.divf %218, %219 : vector<2x32xf32>
    %221 = vector.extract_strided_slice %220 {offsets = [0, 0], sizes = [2, 16], strides = [1, 1]} : vector<2x32xf32> to vector<2x16xf32>
    %222 = vector.extract_strided_slice %220 {offsets = [0, 16], sizes = [2, 16], strides = [1, 1]} : vector<2x32xf32> to vector<2x16xf32>
    %223 = vector.extract_strided_slice %211 {offsets = [0, 32], sizes = [2, 16], strides = [1, 1]} : vector<2x48xf32> to vector<2x16xf32>
    %224 = vector.extract_strided_slice %212 {offsets = [0, 32], sizes = [2, 16], strides = [1, 1]} : vector<2x48xf32> to vector<2x16xf32>
    %225 = arith.mulf %221, %224 : vector<2x16xf32>
    %226 = arith.addf %223, %225 : vector<2x16xf32>
    %227 = math.tanh %226 : vector<2x16xf32>
    %cst_39 = arith.constant 1.000000e+00 : f32
    %228 = vector.broadcast %cst_39 : f32 to vector<2x16xf32>
    %229 = arith.subf %228, %222 : vector<2x16xf32>
    %230 = arith.mulf %229, %227 : vector<2x16xf32>
    %231 = arith.mulf %222, %183 : vector<2x16xf32>
    %232 = arith.addf %230, %231 : vector<2x16xf32>
    %233 = vector.extract_strided_slice %31 {offsets = [3, 0, 0], sizes = [1, 2, 48], strides = [1, 1, 1]} : vector<8x2x48xf32> to vector<1x2x48xf32>
    %234 = vector.shape_cast %233 : vector<1x2x48xf32> to vector<2x48xf32>
    %235 = vector.extract_strided_slice %234 {offsets = [0, 0], sizes = [2, 32], strides = [1, 1]} : vector<2x48xf32> to vector<2x32xf32>
    %236 = vector.extract_strided_slice %210 {offsets = [0, 0], sizes = [2, 32], strides = [1, 1]} : vector<2x48xf32> to vector<2x32xf32>
    %237 = arith.addf %235, %236 : vector<2x32xf32>
    %238 = arith.negf %237 : vector<2x32xf32>
    %239 = math.exp %238 : vector<2x32xf32>
    %cst_40 = arith.constant 1.000000e+00 : f32
    %240 = vector.broadcast %cst_40 : f32 to vector<2x32xf32>
    %241 = arith.addf %240, %239 : vector<2x32xf32>
    %242 = arith.divf %240, %241 : vector<2x32xf32>
    %243 = vector.extract_strided_slice %242 {offsets = [0, 0], sizes = [2, 16], strides = [1, 1]} : vector<2x32xf32> to vector<2x16xf32>
    %244 = vector.extract_strided_slice %242 {offsets = [0, 16], sizes = [2, 16], strides = [1, 1]} : vector<2x32xf32> to vector<2x16xf32>
    %245 = vector.extract_strided_slice %234 {offsets = [0, 32], sizes = [2, 16], strides = [1, 1]} : vector<2x48xf32> to vector<2x16xf32>
    %246 = vector.extract_strided_slice %210 {offsets = [0, 32], sizes = [2, 16], strides = [1, 1]} : vector<2x48xf32> to vector<2x16xf32>
    %247 = arith.mulf %243, %246 : vector<2x16xf32>
    %248 = arith.addf %245, %247 : vector<2x16xf32>
    %249 = math.tanh %248 : vector<2x16xf32>
    %cst_41 = arith.constant 1.000000e+00 : f32
    %250 = vector.broadcast %cst_41 : f32 to vector<2x16xf32>
    %251 = arith.subf %250, %244 : vector<2x16xf32>
    %252 = arith.mulf %251, %249 : vector<2x16xf32>
    %253 = arith.mulf %244, %205 : vector<2x16xf32>
    %254 = arith.addf %252, %253 : vector<2x16xf32>
    %255 = tpu.concatenate %254, %232 in 1 : vector<2x16xf32>, vector<2x16xf32> -> vector<2x32xf32>
    %cst_42 = arith.constant dense<0.000000e+00> : vector<2x144xf32>
    %256 = tpu.matmul %255, %2, %cst_42 {dimension_numbers = #tpu.dot_dimension_numbers<[1], [0], [0], [1], [0, 0, 1, 1], [], []>} : vector<2x32xf32>, vector<32x144xf32>, vector<2x144xf32> -> vector<2x144xf32>
    %257 = vector.broadcast %5 : vector<1x144xf32> to vector<2x144xf32>
    %258 = arith.addf %256, %257 : vector<2x144xf32>
    %259 = vector.extract_strided_slice %258 {offsets = [0, 0], sizes = [2, 48], strides = [1, 1]} : vector<2x144xf32> to vector<2x48xf32>
    %260 = vector.extract_strided_slice %258 {offsets = [0, 48], sizes = [2, 48], strides = [1, 1]} : vector<2x144xf32> to vector<2x48xf32>
    %261 = vector.extract_strided_slice %258 {offsets = [0, 96], sizes = [2, 48], strides = [1, 1]} : vector<2x144xf32> to vector<2x48xf32>
    %262 = vector.extract_strided_slice %260 {offsets = [0, 0], sizes = [2, 32], strides = [1, 1]} : vector<2x48xf32> to vector<2x32xf32>
    %263 = vector.extract_strided_slice %261 {offsets = [0, 0], sizes = [2, 32], strides = [1, 1]} : vector<2x48xf32> to vector<2x32xf32>
    %264 = arith.addf %262, %263 : vector<2x32xf32>
    %265 = arith.negf %264 : vector<2x32xf32>
    %266 = math.exp %265 : vector<2x32xf32>
    %cst_43 = arith.constant 1.000000e+00 : f32
    %267 = vector.broadcast %cst_43 : f32 to vector<2x32xf32>
    %268 = arith.addf %267, %266 : vector<2x32xf32>
    %269 = arith.divf %267, %268 : vector<2x32xf32>
    %270 = vector.extract_strided_slice %269 {offsets = [0, 0], sizes = [2, 16], strides = [1, 1]} : vector<2x32xf32> to vector<2x16xf32>
    %271 = vector.extract_strided_slice %269 {offsets = [0, 16], sizes = [2, 16], strides = [1, 1]} : vector<2x32xf32> to vector<2x16xf32>
    %272 = vector.extract_strided_slice %260 {offsets = [0, 32], sizes = [2, 16], strides = [1, 1]} : vector<2x48xf32> to vector<2x16xf32>
    %273 = vector.extract_strided_slice %261 {offsets = [0, 32], sizes = [2, 16], strides = [1, 1]} : vector<2x48xf32> to vector<2x16xf32>
    %274 = arith.mulf %270, %273 : vector<2x16xf32>
    %275 = arith.addf %272, %274 : vector<2x16xf32>
    %276 = math.tanh %275 : vector<2x16xf32>
    %cst_44 = arith.constant 1.000000e+00 : f32
    %277 = vector.broadcast %cst_44 : f32 to vector<2x16xf32>
    %278 = arith.subf %277, %271 : vector<2x16xf32>
    %279 = arith.mulf %278, %276 : vector<2x16xf32>
    %280 = arith.mulf %271, %232 : vector<2x16xf32>
    %281 = arith.addf %279, %280 : vector<2x16xf32>
    %282 = vector.extract_strided_slice %31 {offsets = [2, 0, 0], sizes = [1, 2, 48], strides = [1, 1, 1]} : vector<8x2x48xf32> to vector<1x2x48xf32>
    %283 = vector.shape_cast %282 : vector<1x2x48xf32> to vector<2x48xf32>
    %284 = vector.extract_strided_slice %283 {offsets = [0, 0], sizes = [2, 32], strides = [1, 1]} : vector<2x48xf32> to vector<2x32xf32>
    %285 = vector.extract_strided_slice %259 {offsets = [0, 0], sizes = [2, 32], strides = [1, 1]} : vector<2x48xf32> to vector<2x32xf32>
    %286 = arith.addf %284, %285 : vector<2x32xf32>
    %287 = arith.negf %286 : vector<2x32xf32>
    %288 = math.exp %287 : vector<2x32xf32>
    %cst_45 = arith.constant 1.000000e+00 : f32
    %289 = vector.broadcast %cst_45 : f32 to vector<2x32xf32>
    %290 = arith.addf %289, %288 : vector<2x32xf32>
    %291 = arith.divf %289, %290 : vector<2x32xf32>
    %292 = vector.extract_strided_slice %291 {offsets = [0, 0], sizes = [2, 16], strides = [1, 1]} : vector<2x32xf32> to vector<2x16xf32>
    %293 = vector.extract_strided_slice %291 {offsets = [0, 16], sizes = [2, 16], strides = [1, 1]} : vector<2x32xf32> to vector<2x16xf32>
    %294 = vector.extract_strided_slice %283 {offsets = [0, 32], sizes = [2, 16], strides = [1, 1]} : vector<2x48xf32> to vector<2x16xf32>
    %295 = vector.extract_strided_slice %259 {offsets = [0, 32], sizes = [2, 16], strides = [1, 1]} : vector<2x48xf32> to vector<2x16xf32>
    %296 = arith.mulf %292, %295 : vector<2x16xf32>
    %297 = arith.addf %294, %296 : vector<2x16xf32>
    %298 = math.tanh %297 : vector<2x16xf32>
    %cst_46 = arith.constant 1.000000e+00 : f32
    %299 = vector.broadcast %cst_46 : f32 to vector<2x16xf32>
    %300 = arith.subf %299, %293 : vector<2x16xf32>
    %301 = arith.mulf %300, %298 : vector<2x16xf32>
    %302 = arith.mulf %293, %254 : vector<2x16xf32>
    %303 = arith.addf %301, %302 : vector<2x16xf32>
    %304 = tpu.concatenate %303, %281 in 1 : vector<2x16xf32>, vector<2x16xf32> -> vector<2x32xf32>
    %cst_47 = arith.constant dense<0.000000e+00> : vector<2x144xf32>
    %305 = tpu.matmul %304, %2, %cst_47 {dimension_numbers = #tpu.dot_dimension_numbers<[1], [0], [0], [1], [0, 0, 1, 1], [], []>} : vector<2x32xf32>, vector<32x144xf32>, vector<2x144xf32> -> vector<2x144xf32>
    %306 = vector.broadcast %5 : vector<1x144xf32> to vector<2x144xf32>
    %307 = arith.addf %305, %306 : vector<2x144xf32>
    %308 = vector.extract_strided_slice %307 {offsets = [0, 0], sizes = [2, 48], strides = [1, 1]} : vector<2x144xf32> to vector<2x48xf32>
    %309 = vector.extract_strided_slice %307 {offsets = [0, 48], sizes = [2, 48], strides = [1, 1]} : vector<2x144xf32> to vector<2x48xf32>
    %310 = vector.extract_strided_slice %307 {offsets = [0, 96], sizes = [2, 48], strides = [1, 1]} : vector<2x144xf32> to vector<2x48xf32>
    %311 = vector.extract_strided_slice %309 {offsets = [0, 0], sizes = [2, 32], strides = [1, 1]} : vector<2x48xf32> to vector<2x32xf32>
    %312 = vector.extract_strided_slice %310 {offsets = [0, 0], sizes = [2, 32], strides = [1, 1]} : vector<2x48xf32> to vector<2x32xf32>
    %313 = arith.addf %311, %312 : vector<2x32xf32>
    %314 = arith.negf %313 : vector<2x32xf32>
    %315 = math.exp %314 : vector<2x32xf32>
    %cst_48 = arith.constant 1.000000e+00 : f32
    %316 = vector.broadcast %cst_48 : f32 to vector<2x32xf32>
    %317 = arith.addf %316, %315 : vector<2x32xf32>
    %318 = arith.divf %316, %317 : vector<2x32xf32>
    %319 = vector.extract_strided_slice %318 {offsets = [0, 0], sizes = [2, 16], strides = [1, 1]} : vector<2x32xf32> to vector<2x16xf32>
    %320 = vector.extract_strided_slice %318 {offsets = [0, 16], sizes = [2, 16], strides = [1, 1]} : vector<2x32xf32> to vector<2x16xf32>
    %321 = vector.extract_strided_slice %309 {offsets = [0, 32], sizes = [2, 16], strides = [1, 1]} : vector<2x48xf32> to vector<2x16xf32>
    %322 = vector.extract_strided_slice %310 {offsets = [0, 32], sizes = [2, 16], strides = [1, 1]} : vector<2x48xf32> to vector<2x16xf32>
    %323 = arith.mulf %319, %322 : vector<2x16xf32>
    %324 = arith.addf %321, %323 : vector<2x16xf32>
    %325 = math.tanh %324 : vector<2x16xf32>
    %cst_49 = arith.constant 1.000000e+00 : f32
    %326 = vector.broadcast %cst_49 : f32 to vector<2x16xf32>
    %327 = arith.subf %326, %320 : vector<2x16xf32>
    %328 = arith.mulf %327, %325 : vector<2x16xf32>
    %329 = arith.mulf %320, %281 : vector<2x16xf32>
    %330 = arith.addf %328, %329 : vector<2x16xf32>
    %331 = vector.extract_strided_slice %31 {offsets = [1, 0, 0], sizes = [1, 2, 48], strides = [1, 1, 1]} : vector<8x2x48xf32> to vector<1x2x48xf32>
    %332 = vector.shape_cast %331 : vector<1x2x48xf32> to vector<2x48xf32>
    %333 = vector.extract_strided_slice %332 {offsets = [0, 0], sizes = [2, 32], strides = [1, 1]} : vector<2x48xf32> to vector<2x32xf32>
    %334 = vector.extract_strided_slice %308 {offsets = [0, 0], sizes = [2, 32], strides = [1, 1]} : vector<2x48xf32> to vector<2x32xf32>
    %335 = arith.addf %333, %334 : vector<2x32xf32>
    %336 = arith.negf %335 : vector<2x32xf32>
    %337 = math.exp %336 : vector<2x32xf32>
    %cst_50 = arith.constant 1.000000e+00 : f32
    %338 = vector.broadcast %cst_50 : f32 to vector<2x32xf32>
    %339 = arith.addf %338, %337 : vector<2x32xf32>
    %340 = arith.divf %338, %339 : vector<2x32xf32>
    %341 = vector.extract_strided_slice %340 {offsets = [0, 0], sizes = [2, 16], strides = [1, 1]} : vector<2x32xf32> to vector<2x16xf32>
    %342 = vector.extract_strided_slice %340 {offsets = [0, 16], sizes = [2, 16], strides = [1, 1]} : vector<2x32xf32> to vector<2x16xf32>
    %343 = vector.extract_strided_slice %332 {offsets = [0, 32], sizes = [2, 16], strides = [1, 1]} : vector<2x48xf32> to vector<2x16xf32>
    %344 = vector.extract_strided_slice %308 {offsets = [0, 32], sizes = [2, 16], strides = [1, 1]} : vector<2x48xf32> to vector<2x16xf32>
    %345 = arith.mulf %341, %344 : vector<2x16xf32>
    %346 = arith.addf %343, %345 : vector<2x16xf32>
    %347 = math.tanh %346 : vector<2x16xf32>
    %cst_51 = arith.constant 1.000000e+00 : f32
    %348 = vector.broadcast %cst_51 : f32 to vector<2x16xf32>
    %349 = arith.subf %348, %342 : vector<2x16xf32>
    %350 = arith.mulf %349, %347 : vector<2x16xf32>
    %351 = arith.mulf %342, %303 : vector<2x16xf32>
    %352 = arith.addf %350, %351 : vector<2x16xf32>
    %353 = tpu.concatenate %352, %330 in 1 : vector<2x16xf32>, vector<2x16xf32> -> vector<2x32xf32>
    %cst_52 = arith.constant dense<0.000000e+00> : vector<2x144xf32>
    %354 = tpu.matmul %353, %2, %cst_52 {dimension_numbers = #tpu.dot_dimension_numbers<[1], [0], [0], [1], [0, 0, 1, 1], [], []>} : vector<2x32xf32>, vector<32x144xf32>, vector<2x144xf32> -> vector<2x144xf32>
    %355 = vector.broadcast %5 : vector<1x144xf32> to vector<2x144xf32>
    %356 = arith.addf %354, %355 : vector<2x144xf32>
    %357 = vector.extract_strided_slice %356 {offsets = [0, 0], sizes = [2, 48], strides = [1, 1]} : vector<2x144xf32> to vector<2x48xf32>
    %358 = vector.extract_strided_slice %356 {offsets = [0, 48], sizes = [2, 48], strides = [1, 1]} : vector<2x144xf32> to vector<2x48xf32>
    %359 = vector.extract_strided_slice %356 {offsets = [0, 96], sizes = [2, 48], strides = [1, 1]} : vector<2x144xf32> to vector<2x48xf32>
    %360 = vector.extract_strided_slice %358 {offsets = [0, 0], sizes = [2, 32], strides = [1, 1]} : vector<2x48xf32> to vector<2x32xf32>
    %361 = vector.extract_strided_slice %359 {offsets = [0, 0], sizes = [2, 32], strides = [1, 1]} : vector<2x48xf32> to vector<2x32xf32>
    %362 = arith.addf %360, %361 : vector<2x32xf32>
    %363 = arith.negf %362 : vector<2x32xf32>
    %364 = math.exp %363 : vector<2x32xf32>
    %cst_53 = arith.constant 1.000000e+00 : f32
    %365 = vector.broadcast %cst_53 : f32 to vector<2x32xf32>
    %366 = arith.addf %365, %364 : vector<2x32xf32>
    %367 = arith.divf %365, %366 : vector<2x32xf32>
    %368 = vector.extract_strided_slice %367 {offsets = [0, 0], sizes = [2, 16], strides = [1, 1]} : vector<2x32xf32> to vector<2x16xf32>
    %369 = vector.extract_strided_slice %367 {offsets = [0, 16], sizes = [2, 16], strides = [1, 1]} : vector<2x32xf32> to vector<2x16xf32>
    %370 = vector.extract_strided_slice %358 {offsets = [0, 32], sizes = [2, 16], strides = [1, 1]} : vector<2x48xf32> to vector<2x16xf32>
    %371 = vector.extract_strided_slice %359 {offsets = [0, 32], sizes = [2, 16], strides = [1, 1]} : vector<2x48xf32> to vector<2x16xf32>
    %372 = arith.mulf %368, %371 : vector<2x16xf32>
    %373 = arith.addf %370, %372 : vector<2x16xf32>
    %374 = math.tanh %373 : vector<2x16xf32>
    %cst_54 = arith.constant 1.000000e+00 : f32
    %375 = vector.broadcast %cst_54 : f32 to vector<2x16xf32>
    %376 = arith.subf %375, %369 : vector<2x16xf32>
    %377 = arith.mulf %376, %374 : vector<2x16xf32>
    %378 = arith.mulf %369, %330 : vector<2x16xf32>
    %379 = arith.addf %377, %378 : vector<2x16xf32>
    %380 = vector.extract_strided_slice %31 {offsets = [0, 0, 0], sizes = [1, 2, 48], strides = [1, 1, 1]} : vector<8x2x48xf32> to vector<1x2x48xf32>
    %381 = vector.shape_cast %380 : vector<1x2x48xf32> to vector<2x48xf32>
    %382 = vector.extract_strided_slice %381 {offsets = [0, 0], sizes = [2, 32], strides = [1, 1]} : vector<2x48xf32> to vector<2x32xf32>
    %383 = vector.extract_strided_slice %357 {offsets = [0, 0], sizes = [2, 32], strides = [1, 1]} : vector<2x48xf32> to vector<2x32xf32>
    %384 = arith.addf %382, %383 : vector<2x32xf32>
    %385 = arith.negf %384 : vector<2x32xf32>
    %386 = math.exp %385 : vector<2x32xf32>
    %cst_55 = arith.constant 1.000000e+00 : f32
    %387 = vector.broadcast %cst_55 : f32 to vector<2x32xf32>
    %388 = arith.addf %387, %386 : vector<2x32xf32>
    %389 = arith.divf %387, %388 : vector<2x32xf32>
    %390 = vector.extract_strided_slice %389 {offsets = [0, 0], sizes = [2, 16], strides = [1, 1]} : vector<2x32xf32> to vector<2x16xf32>
    %391 = vector.extract_strided_slice %389 {offsets = [0, 16], sizes = [2, 16], strides = [1, 1]} : vector<2x32xf32> to vector<2x16xf32>
    %392 = vector.extract_strided_slice %381 {offsets = [0, 32], sizes = [2, 16], strides = [1, 1]} : vector<2x48xf32> to vector<2x16xf32>
    %393 = vector.extract_strided_slice %357 {offsets = [0, 32], sizes = [2, 16], strides = [1, 1]} : vector<2x48xf32> to vector<2x16xf32>
    %394 = arith.mulf %390, %393 : vector<2x16xf32>
    %395 = arith.addf %392, %394 : vector<2x16xf32>
    %396 = math.tanh %395 : vector<2x16xf32>
    %cst_56 = arith.constant 1.000000e+00 : f32
    %397 = vector.broadcast %cst_56 : f32 to vector<2x16xf32>
    %398 = arith.subf %397, %391 : vector<2x16xf32>
    %399 = arith.mulf %398, %396 : vector<2x16xf32>
    %400 = arith.mulf %391, %352 : vector<2x16xf32>
    %401 = arith.addf %399, %400 : vector<2x16xf32>
    %402 = tpu.concatenate %401, %379 in 1 : vector<2x16xf32>, vector<2x16xf32> -> vector<2x32xf32>
    %cst_57 = arith.constant dense<0.000000e+00> : vector<2x144xf32>
    %403 = tpu.matmul %402, %2, %cst_57 {dimension_numbers = #tpu.dot_dimension_numbers<[1], [0], [0], [1], [0, 0, 1, 1], [], []>} : vector<2x32xf32>, vector<32x144xf32>, vector<2x144xf32> -> vector<2x144xf32>
    %404 = vector.broadcast %5 : vector<1x144xf32> to vector<2x144xf32>
    %405 = arith.addf %403, %404 : vector<2x144xf32>
    %406 = vector.extract_strided_slice %405 {offsets = [0, 48], sizes = [2, 48], strides = [1, 1]} : vector<2x144xf32> to vector<2x48xf32>
    %407 = vector.extract_strided_slice %405 {offsets = [0, 96], sizes = [2, 48], strides = [1, 1]} : vector<2x144xf32> to vector<2x48xf32>
    %408 = vector.extract_strided_slice %406 {offsets = [0, 0], sizes = [2, 32], strides = [1, 1]} : vector<2x48xf32> to vector<2x32xf32>
    %409 = vector.extract_strided_slice %407 {offsets = [0, 0], sizes = [2, 32], strides = [1, 1]} : vector<2x48xf32> to vector<2x32xf32>
    %410 = arith.addf %408, %409 : vector<2x32xf32>
    %411 = arith.negf %410 : vector<2x32xf32>
    %412 = math.exp %411 : vector<2x32xf32>
    %cst_58 = arith.constant 1.000000e+00 : f32
    %413 = vector.broadcast %cst_58 : f32 to vector<2x32xf32>
    %414 = arith.addf %413, %412 : vector<2x32xf32>
    %415 = arith.divf %413, %414 : vector<2x32xf32>
    %416 = vector.extract_strided_slice %415 {offsets = [0, 0], sizes = [2, 16], strides = [1, 1]} : vector<2x32xf32> to vector<2x16xf32>
    %417 = vector.extract_strided_slice %415 {offsets = [0, 16], sizes = [2, 16], strides = [1, 1]} : vector<2x32xf32> to vector<2x16xf32>
    %418 = vector.extract_strided_slice %406 {offsets = [0, 32], sizes = [2, 16], strides = [1, 1]} : vector<2x48xf32> to vector<2x16xf32>
    %419 = vector.extract_strided_slice %407 {offsets = [0, 32], sizes = [2, 16], strides = [1, 1]} : vector<2x48xf32> to vector<2x16xf32>
    %420 = arith.mulf %416, %419 : vector<2x16xf32>
    %421 = arith.addf %418, %420 : vector<2x16xf32>
    %422 = math.tanh %421 : vector<2x16xf32>
    %cst_59 = arith.constant 1.000000e+00 : f32
    %423 = vector.broadcast %cst_59 : f32 to vector<2x16xf32>
    %424 = arith.subf %423, %417 : vector<2x16xf32>
    %425 = arith.mulf %424, %422 : vector<2x16xf32>
    %426 = arith.mulf %417, %379 : vector<2x16xf32>
    %427 = arith.addf %425, %426 : vector<2x16xf32>
    %428 = tpu.concatenate %85, %134, %183, %232, %281, %330, %379, %427 in 1 : vector<2x16xf32>, vector<2x16xf32>, vector<2x16xf32>, vector<2x16xf32>, vector<2x16xf32>, vector<2x16xf32>, vector<2x16xf32>, vector<2x16xf32> -> vector<2x128xf32>
    %c0_60 = arith.constant 0 : index
    %c0_61 = arith.constant 0 : index
    %429 = vector.load %arg3[%c0_60, %c0_61] : memref<2x128xf32, #tpu.memory_space<vmem>>, vector<2x128xf32>
    tpu.vector_store %arg3[%c0_60, %c0_61], %428 {strides = array<i32>} : memref<2x128xf32, #tpu.memory_space<vmem>>, vector<2x128xf32>,
    return
  }
}

</mosaic_0001>

<bundles_post_ra>
// kernel: decoder_forward.1
= control target key start
LH: loop header
LB: loop body
LE: loop exit
PB: predicated region body
PF: predicated region fallthrough
CT: control target
= control target key end

     0   :  { %v1627_v0 = vmov 0.0   ;;  %vm115_vm0 = vcmask 130048   ;;  %vm1628_vm1 = vmmov 0   ;;  %vm34_vm4 = vcmask 195584   ;;  %s1629_s5 = smov 96   ;;  %s1630_s10 = smov 32   ;;  %s2043_s2 = inlined_call_operand.vmem [shape: f32[112,144], index: 2, kind: input, shape index: {}]   ;;  %s2044_s1 = inlined_call_operand.vmem [shape: f32[2,8,16], index: 1, kind: input, shape index: {}]   ;;  %s2045_s0 = inlined_call_operand.vmem [shape: f32[2,24], index: 0, kind: input, shape index: {}]   ;;  %s2046_s3 = inlined_call_operand.vmem [shape: f32[2,128], index: 3, kind: output, shape index: {}]  }
   0x1   :  { %1502 = vmatprep.subr.mxu0 %v1627_v0  ;;  %v16_v1 = vld [vmem:[%s2043_s2 + $0x20] sm:$0xff]  ;;  %v15_v2 = vld [vmem:[%s2043_s2 + $0x10] sm:$0xff]  ;;  %1508 = vmatprep.mubr.msk.f32.mxu0 %vm1628_vm1, %v1627_v0  ;;  %v110_v4 = vld [vmem:[%s2044_s1 + $0x8] sm:$0xff]  ;;  %v202_v15 = vlaneseq  ;;  %vm212_vm7 = vcmask 1041409   ;;  %vm126_vm8 = vcmask 261120   ;;  %s1631_s24 = smov 112  }
   0x2   :  { %v109_v3 = vld [vmem:[%s2044_s1] sm:$0xff]  ;;  %1503 = vmatpush3.msra.mxu0 %v16_v1  ;;  %1511 = vmatprep.subr.mxu1 %v1627_v0  ;;  %vm112_vm3 = vcmp.gt.f32.partialorder %v110_v4, 0.0  ;;  %v19_v12 = vld [vmem:[%s2043_s2 + $0x50] sm:$0xff]  ;;  %v1737_v52 = vld [vmem:[%s2043_s2 + $0xa8] sm:$0xff]  ;;  %s1633_s26 = smov 48   ;;  %s1634_s27 = smov 64  }
   0x3   :  { %vm111_vm2 = vcmp.gt.f32.partialorder %v109_v3, 0.0  ;;  %1504 = vmatprep.subr.mxu0 %v1627_v0  ;;  %v14_v6 = vld [vmem:[%s2043_s2] sm:$0xff]  ;;  %1519 = vmatprep.mubr.msk.f32.mxu1 %vm1628_vm1, %v1627_v0  ;;  %v114_v9 = vsel %vm112_vm3, 1.0, %v110_v4  ;;  %v17_v14 = vld [vmem:[%s2043_s2 + $0x30] sm:$0xff]  ;;  %v203_v16 = vand.u32 127, %v202_v15  ;;  %v1698_v17 = vshrl.u32 %v202_v15, 7 }
   0x4   :  { %v113_v5 = vsel %vm111_vm2, 1.0, %v109_v3  ;;  %1505 = vmatpush3.msra.mxu0 %v15_v2  ;;  %v33_v8 = vld [vmem:[%s2045_s0] sm:$0x3]  ;;  %v119_v10 = vsel %vm115_vm0, %v114_v9, 0.0  ;;  %v29_v29 = vld [vmem:[%s2043_s2 + $0xb0] ss:$0 sm:$0xff] }
   0x5   :  { %v116_v7 = vsel %vm115_vm0, %v113_v5, 0.0  ;;  %1506 = vmatprep.subr.mxu0 %v1627_v0  ;;  %v20_v11 = vld [vmem:[%s2043_s2 + $0x60] sm:$0xff]  ;;  %v206_v19 = vsub.s32 %v203_v16, %v1698_v17  ;;  %v249_v25 = vsub.s32 0, %v1698_v17  ;;  %v1705_v27 = vld [vmem:[%s2043_s2 + $0xd0] ss:$8 sm:$0x3] }
   0x6   :  { %117 = vadd.xlane.f32.xlu0 %v116_v7  ;;  %1507 = vmatpush3.msra.mxu0 %v14_v6  ;;  %v18_v13 = vld [vmem:[%s2043_s2 + $0x40] sm:$0xff]  ;;  %v298_v34 = vsub.s32 7, %v1698_v17  ;;  %v1747_v54 = vld [vmem:[%s2043_s2 + $0x98] sm:$0xff]  ;;  %v1753_v55 = vld [vmem:[%s2043_s2 + $0x90] sm:$0xff]  ;;  %v291_v59 = vsub.s32 6, %v1698_v17  ;;  %v256_v7 = vsub.s32 1, %v1698_v17 }
   0x7   :  { %1509 = vmatmul.mubr.msk.f32.vlgmr.msra.gmra.mxu0 %vm34_vm4, %v33_v8  ;;  %1512 = vmatpush3.msra.mxu1 %v20_v11  ;;  %v1710_v28 = vrot.slane %v1705_v27, %v249_v25  ;;  %v1726_v38 = vld [vmem:[%s2043_s2 + $0xc0] ss:$0 sm:$0xff]  ;;  %v1760_v56 = vld [vmem:[%s2043_s2 + $0x88] sm:$0xff]  ;;  %v1774_v58 = vld [vmem:[%s2043_s2 + $0x78] sm:$0xff]  ;;  %s1635_s28 = smov 16   ;;  %vm1451_vm9 = vcmask 392192  }
   0x8   :  { %427 = vmatprep.mubr.f32.mxu0 %v1627_v0  ;;  %1513 = vmatprep.subr.mxu1 %v1627_v0  ;;  %v1742_v53 = vld [vmem:[%s2043_s2 + $0xa0] sm:$0xff]  ;;  %v1789_v62 = vld [vmem:[%s2043_s2 + $0x70] sm:$0xff]  ;;  %v1811_v8 = vrot.slane %v1705_v27, %v256_v7  ;;  %vm1453_vm10 = vcmask 523264   ;;  %vm1455_vm11 = vcmask 654336   ;;  %vm1457_vm12 = vcmask 785408  }
   0x9   :  { %1514 = vmatpush3.msra.mxu1 %v19_v12  ;;  %387 = vmatprep.subr.mxu0 %v1737_v52  ;;  %v1767_v57 = vld [vmem:[%s2043_s2 + $0x80] sm:$0xff]  ;;  %s1632_s2 = smov 80   ;;  %vm1459_vm13 = vcmask 916480  }
   0xa   :  { %120 = vadd.xlane.f32.xlu0 %v119_v10  ;;  %1515 = vmatprep.subr.mxu1 %v1627_v0 }
   0xb   :  { %1516 = vmatpush3.msra.mxu1 %v18_v13  ;;  %388 = vmatpush1.msra.mxu0 %v1742_v53 }
   0xc   :  { %1517 = vmatprep.subr.mxu1 %v1627_v0  ;;  %389 = vmatprep.subr.mxu0 %v1747_v54 }
   0xd   :  { %1518 = vmatpush3.msra.mxu1 %v17_v14  ;;  %390 = vmatpush1.msra.mxu0 %v1753_v55 }
   0xe   :  { %525 = vmatprep.subr.mxu1 %v1737_v52  ;;  %391 = vmatprep.subr.mxu0 %v1760_v56 }
   0xf   :  { %392 = vmatpush1.msra.mxu0 %v1767_v57 }
  0x10   :  { %393 = vmatprep.subr.mxu0 %v1774_v58 }
  0x11   :  { %394 = vmatpush1.msra.mxu0 %v1789_v62 }
  0x12   :  { %663 = vmatprep.subr.mxu0 %v1737_v52 }
  0x20   :  { %332 = vrot.lane.b32.xlu0 %v1710_v28, %s1629_s5 }
  0x8f   :  { %v118_v18 = vpop.xlane.xlu0 %117 }
  0x90   :  { %vm122_vm5 = vcmp.ge.f32.partialorder %v118_v18, 1.0 }
  0x91   :  { %v124_v20 = vsel %vm122_vm5, 1.0, %v118_v18 }
  0x92   :  { %v207_v23 = vrot.slane %v124_v20, %v206_v19 }
  0x93   :  { %v121_v21 = vpop.xlane.xlu0 %120 }
  0x94   :  { %vm123_vm6 = vcmp.ge.f32.partialorder %v121_v21, 1.0 }
  0x95   :  { %v125_v22 = vsel %vm123_vm6, 1.0, %v121_v21 }
  0x96   :  { %v211_v24 = vrot.slane %v125_v22, %v206_v19 }
  0x97   :  { %v333_v47 = vpop.permute.xlu0 %332 }
  0x98   :  { %v213_v26 = vsel %vm212_vm7, %v211_v24, %v207_v23 }
  0x99   :  { %215 = vxpose.xlu1.b32.start.end [1/1] (short) (narrow) %v213_v26, 8 }
  0xc7   :  { %v104_v30 = vpop.f32.mrf.mxu0 }
  0xc8   :  { %v105_v31 = vadd.f32 %v104_v30, %v29_v29 }
  0xc9   :  { %v1510_v32 = vpop.f32.mrf.mxu0 }
  0xca   :  { %v108_v33 = vmax.f32 %v105_v31, 0.0 }
  0xcc   :  { %1520 = vmatmul.mubr.msk.f32.vlgmr.msra.gmra.mxu1 %vm126_vm8, %v108_v33 }
  0xcd   :  { %565 = vmatprep.mubr.f32.mxu1 %v1627_v0  ;;  %526 = vmatpush1.msra.mxu1 %v1742_v53 }
  0xce   :  { %527 = vmatprep.subr.mxu1 %v1747_v54 }
  0xcf   :  { %528 = vmatpush1.msra.mxu1 %v1753_v55 }
  0xd0   :  { %529 = vmatprep.subr.mxu1 %v1760_v56 }
  0xd1   :  { %530 = vmatpush1.msra.mxu1 %v1767_v57 }
  0xd2   :  { %531 = vmatprep.subr.mxu1 %v1774_v58 }
  0xd3   :  { %532 = vmatpush1.msra.mxu1 %v1789_v62 }
  0xd4   :  { %801 = vmatprep.subr.mxu1 %v1737_v52 }
 0x115   :  { %v1720_v35 = vpop.trf.xlu1 }
 0x116   :  { %v299_v36 = vrot.slane %v1720_v35, %v298_v34  ;;  %v292_v61 = vrot.slane %v1720_v35, %v291_v59 }
 0x118   :  { %301 = vbcast.lane.b32.xlu1 %v299_v36, 256 }
 0x18a   :  { %v302_v37 = vpop.permute.xlu1 %301 }
 0x18c   :  { %v1728_v39 = vpop.f32.mrf.mxu1 }
 0x18d   :  { %v310_v40 = vmul.f32 %v302_v37, %v1728_v39 }
 0x18e   :  { %v1521_v41 = vpop.f32.mrf.mxu1 }
 0x18f   :  { %v318_v42 = vadd.f32 %v310_v40, %v1726_v38 }
 0x191   :  { %v325_v43 = vadd.f32 %v1710_v28, %v318_v42 }
 0x193   :  { %v1469_v44 = vmul.f32 -1.442695, %v325_v43 }
 0x195   :  { %1531 = vpow2.f32 %v1469_v44 }
 0x1a2   :  { %v1532_v45 = vpop.eup %1531 }
 0x1a3   :  { %v329_v46 = vadd.f32 1.0, %v1532_v45 }
 0x1a5   :  { %1533 = vrcp.f32 %v329_v46 }
 0x1b2   :  { %v1534_v48 = vpop.eup %1533 }
 0x1b3   :  { %v335_v49 = vmul.f32 %v1534_v48, %v333_v47  ;;  %v342_v63 = vsub.f32 1.0, %v1534_v48  ;;  %v348_v2 = vmul.f32 0.0, %v1534_v48  ;;  %v284_v48 = vsub.s32 5, %v1698_v17 }
 0x1b5   :  { %337 = vrot.lane.b32.xlu0 %v335_v49, %s1630_s10  ;;  %v285_v49 = vrot.slane %v1720_v35, %v284_v48 }
 0x227   :  { %v338_v50 = vpop.permute.xlu0 %337 }
 0x228   :  { %v340_v51 = vadd.f32 %v338_v50, %v318_v42 }
 0x22a   :  { %1535 = vtanh.f32 %v340_v51 }
 0x237   :  { %v1536_v60 = vpop.eup %1535 }
 0x238   :  { %344 = vrot.lane.b32.xlu0 %v1536_v60, %s1631_s24 }
 0x23c   :  { %294 = vbcast.lane.b32.xlu0 %v292_v61, 256 }
 0x2aa   :  { %v345_v1 = vpop.permute.xlu0 %344 }
 0x2ab   :  { %v347_v3 = vmul.f32 %v345_v1, %v342_v63 }
 0x2ad   :  { %v349_v4 = vadd.f32 %v348_v2, %v347_v3 }
 0x2ae   :  { %v295_v13 = vpop.permute.xlu0 %294 }
 0x2af   :  { %351 = vrot.lane.b32.xlu1 %v349_v4, %s1631_s24  ;;  %v309_v14 = vmul.f32 %v295_v13, %v1728_v39 }
 0x2b1   :  { %v317_v15 = vadd.f32 %v309_v14, %v1726_v38 }
 0x321   :  { %v352_v5 = vpop.permute.xlu1 %351 }
 0x322   :  { %v354_v6 = vsel %vm115_vm0, %v352_v5, 0.0 }
 0x323   :  { %1470 = vmatmul.mubr.msk.f32.vlgmr.msra.gmra.mxu0 %vm126_vm8, %v354_v6 }
 0x324   :  { %664 = vmatpush1.msra.mxu0 %v1742_v53  ;;  %703 = vmatprep.mubr.f32.mxu0 %v1627_v0 }
 0x325   :  { %665 = vmatprep.subr.mxu0 %v1747_v54 }
 0x326   :  { %666 = vmatpush1.msra.mxu0 %v1753_v55 }
 0x327   :  { %667 = vmatprep.subr.mxu0 %v1760_v56 }
 0x328   :  { %668 = vmatpush1.msra.mxu0 %v1767_v57 }
 0x329   :  { %669 = vmatprep.subr.mxu0 %v1774_v58 }
 0x32a   :  { %670 = vmatpush1.msra.mxu0 %v1789_v62 }
 0x32b   :  { %939 = vmatprep.subr.mxu0 %v1737_v52 }
 0x3e3   :  { %v429_v9 = vpop.f32.mrf.mxu0 }
 0x3e4   :  { %v430_v10 = vadd.f32 %v429_v9, %v1710_v28 }
 0x3e5   :  { %v431_v11 = vpop.f32.mrf.mxu0 }
 0x3e6   :  { %v432_v12 = vadd.f32 %v431_v11, %v1811_v8  ;;  %435 = vrot.lane.b32.xlu1 %v430_v10, %s1632_s2  ;;  %v464_v16 = vadd.f32 %v430_v10, %v317_v15 }
 0x3e8   :  { %446 = vrot.lane.b32.xlu0 %v432_v12, %s1633_s26  ;;  %v1472_v18 = vmul.f32 -1.442695, %v464_v16 }
 0x3ea   :  { %471 = vrot.lane.b32.xlu1 %v430_v10, %s1629_s5  ;;  %1537 = vpow2.f32 %v1472_v18 }
 0x3f7   :  { %v1538_v19 = vpop.eup %1537 }
 0x3f8   :  { %v468_v20 = vadd.f32 1.0, %v1538_v19 }
 0x3fa   :  { %1539 = vrcp.f32 %v468_v20 }
 0x407   :  { %v1540_v24 = vpop.eup %1539 }
 0x408   :  { %v481_v43 = vsub.f32 1.0, %v1540_v24  ;;  %v487_v45 = vmul.f32 %v1540_v24, %v349_v4 }
 0x458   :  { %v436_v21 = vpop.permute.xlu1 %435 }
 0x459   :  { %v438_v22 = vadd.f32 %v436_v21, %v430_v10 }
 0x45a   :  { %v447_v32 = vpop.permute.xlu0 %446 }
 0x45b   :  { %v1471_v23 = vmul.f32 -1.442695, %v438_v22 }
 0x45c   :  { %v472_v26 = vpop.permute.xlu1 %471 }
 0x45d   :  { %1541 = vpow2.f32 %v1471_v23  ;;  %v474_v27 = vmul.f32 %v1540_v24, %v472_v26 }
 0x45f   :  { %476 = vrot.lane.b32.xlu1 %v474_v27, %s1630_s10 }
 0x46a   :  { %v1542_v29 = vpop.eup %1541 }
 0x46b   :  { %v442_v30 = vadd.f32 1.0, %v1542_v29 }
 0x46d   :  { %1543 = vrcp.f32 %v442_v30 }
 0x47a   :  { %v1544_v31 = vpop.eup %1543 }
 0x47b   :  { %v449_v33 = vmul.f32 %v1544_v31, %v447_v32  ;;  %v456_v50 = vsub.f32 1.0, %v1544_v31  ;;  %v462_v59 = vmul.f32 0.0, %v1544_v31 }
 0x47d   :  { %451 = vrot.lane.b32.xlu0 %v449_v33, %s1630_s10 }
 0x4d1   :  { %v477_v34 = vpop.permute.xlu1 %476 }
 0x4d2   :  { %v479_v36 = vadd.f32 %v477_v34, %v317_v15 }
 0x4d4   :  { %1545 = vtanh.f32 %v479_v36 }
 0x4e1   :  { %v1546_v37 = vpop.eup %1545 }
 0x4e2   :  { %483 = vrot.lane.b32.xlu1 %v1546_v37, %s1631_s24 }
 0x4ef   :  { %v452_v40 = vpop.permute.xlu0 %451 }
 0x4f0   :  { %v454_v41 = vadd.f32 %v452_v40, %v430_v10 }
 0x4f2   :  { %1547 = vtanh.f32 %v454_v41 }
 0x4ff   :  { %v1548_v42 = vpop.eup %1547 }
 0x500   :  { %458 = vrot.lane.b32.xlu0 %v1548_v42, %s1631_s24 }
 0x554   :  { %v484_v44 = vpop.permute.xlu1 %483 }
 0x555   :  { %v486_v46 = vmul.f32 %v484_v44, %v481_v43  ;;  %v277_v44 = vsub.s32 4, %v1698_v17 }
 0x557   :  { %v1824_v47 = vadd.f32 %v487_v45, %v486_v46  ;;  %v278_v45 = vrot.slane %v1720_v35, %v277_v44 }
 0x559   :  { %490 = vrot.lane.b32.xlu0 %v1824_v47, %s1631_s24 }
 0x55d   :  { %287 = vbcast.lane.b32.xlu0 %v285_v49, 256 }
 0x572   :  { %v459_v51 = vpop.permute.xlu0 %458 }
 0x573   :  { %v461_v60 = vmul.f32 %v459_v51, %v456_v50 }
 0x575   :  { %v1830_v61 = vadd.f32 %v462_v59, %v461_v60 }
 0x577   :  { %494 = vrot.lane.b32.xlu1 %v1830_v61, %s1632_s2 }
 0x5cb   :  { %v491_v63 = vpop.permute.xlu0 %490 }
 0x5cf   :  { %v288_v9 = vpop.permute.xlu0 %287 }
 0x5d0   :  { %v308_v10 = vmul.f32 %v288_v9, %v1728_v39 }
 0x5d2   :  { %v316_v11 = vadd.f32 %v308_v10, %v1726_v38 }
 0x5e9   :  { %v495_v1 = vpop.permute.xlu1 %494 }
 0x5ea   :  { %v497_v2 = vsel %vm115_vm0, %v491_v63, %v495_v1 }
 0x5eb   :  { %1473 = vmatmul.mubr.msk.f32.vlgmr.msra.gmra.mxu1 %vm126_vm8, %v497_v2 }
 0x5ec   :  { %802 = vmatpush1.msra.mxu1 %v1742_v53  ;;  %841 = vmatprep.mubr.f32.mxu1 %v1627_v0 }
 0x5ed   :  { %803 = vmatprep.subr.mxu1 %v1747_v54 }
 0x5ee   :  { %804 = vmatpush1.msra.mxu1 %v1753_v55 }
 0x5ef   :  { %805 = vmatprep.subr.mxu1 %v1760_v56 }
 0x5f0   :  { %806 = vmatpush1.msra.mxu1 %v1767_v57 }
 0x5f1   :  { %807 = vmatprep.subr.mxu1 %v1774_v58 }
 0x5f2   :  { %808 = vmatpush1.msra.mxu1 %v1789_v62 }
 0x5f3   :  { %1077 = vmatprep.subr.mxu1 %v1737_v52 }
 0x6ab   :  { %v567_v3 = vpop.f32.mrf.mxu1 }
 0x6ac   :  { %v568_v4 = vadd.f32 %v567_v3, %v1710_v28 }
 0x6ad   :  { %v569_v5 = vpop.f32.mrf.mxu1 }
 0x6ae   :  { %v570_v6 = vadd.f32 %v569_v5, %v1811_v8  ;;  %573 = vrot.lane.b32.xlu1 %v568_v4, %s1632_s2  ;;  %v602_v12 = vadd.f32 %v568_v4, %v316_v11 }
 0x6b0   :  { %584 = vrot.lane.b32.xlu0 %v570_v6, %s1633_s26  ;;  %v1475_v13 = vmul.f32 -1.442695, %v602_v12 }
 0x6b2   :  { %609 = vrot.lane.b32.xlu1 %v568_v4, %s1629_s5  ;;  %1549 = vpow2.f32 %v1475_v13 }
 0x6bf   :  { %v1550_v14 = vpop.eup %1549 }
 0x6c0   :  { %v606_v15 = vadd.f32 1.0, %v1550_v14 }
 0x6c2   :  { %1551 = vrcp.f32 %v606_v15 }
 0x6cf   :  { %v1552_v20 = vpop.eup %1551 }
 0x6d0   :  { %v619_v37 = vsub.f32 1.0, %v1552_v20  ;;  %v625_v41 = vmul.f32 %v1552_v20, %v1824_v47 }
 0x720   :  { %v574_v16 = vpop.permute.xlu1 %573 }
 0x721   :  { %v576_v18 = vadd.f32 %v574_v16, %v568_v4 }
 0x722   :  { %v585_v27 = vpop.permute.xlu0 %584 }
 0x723   :  { %v1474_v19 = vmul.f32 -1.442695, %v576_v18 }
 0x724   :  { %v610_v21 = vpop.permute.xlu1 %609 }
 0x725   :  { %1553 = vpow2.f32 %v1474_v19  ;;  %v612_v22 = vmul.f32 %v1552_v20, %v610_v21 }
 0x727   :  { %614 = vrot.lane.b32.xlu1 %v612_v22, %s1630_s10 }
 0x732   :  { %v1554_v23 = vpop.eup %1553 }
 0x733   :  { %v580_v24 = vadd.f32 1.0, %v1554_v23 }
 0x735   :  { %1555 = vrcp.f32 %v580_v24 }
 0x742   :  { %v1556_v26 = vpop.eup %1555 }
 0x743   :  { %v587_v29 = vmul.f32 %v1556_v26, %v585_v27  ;;  %v594_v46 = vsub.f32 1.0, %v1556_v26  ;;  %v600_v49 = vmul.f32 %v1556_v26, %v1830_v61 }
 0x745   :  { %589 = vrot.lane.b32.xlu0 %v587_v29, %s1630_s10 }
 0x799   :  { %v615_v30 = vpop.permute.xlu1 %614 }
 0x79a   :  { %v617_v31 = vadd.f32 %v615_v30, %v316_v11 }
 0x79c   :  { %1557 = vtanh.f32 %v617_v31 }
 0x7a9   :  { %v1558_v32 = vpop.eup %1557 }
 0x7aa   :  { %621 = vrot.lane.b32.xlu1 %v1558_v32, %s1631_s24 }
 0x7b7   :  { %v590_v33 = vpop.permute.xlu0 %589 }
 0x7b8   :  { %v592_v34 = vadd.f32 %v590_v33, %v568_v4 }
 0x7ba   :  { %1559 = vtanh.f32 %v592_v34 }
 0x7c7   :  { %v1560_v36 = vpop.eup %1559 }
 0x7c8   :  { %596 = vrot.lane.b32.xlu0 %v1560_v36, %s1631_s24 }
 0x81c   :  { %v622_v40 = vpop.permute.xlu1 %621 }
 0x81d   :  { %v624_v42 = vmul.f32 %v622_v40, %v619_v37 }
 0x81f   :  { %v1857_v43 = vadd.f32 %v625_v41, %v624_v42  ;;  %v270_v41 = vsub.s32 3, %v1698_v17 }
 0x821   :  { %628 = vrot.lane.b32.xlu0 %v1857_v43, %s1631_s24  ;;  %v271_v42 = vrot.slane %v1720_v35, %v270_v41 }
 0x825   :  { %280 = vbcast.lane.b32.xlu0 %v278_v45, 256 }
 0x83a   :  { %v597_v48 = vpop.permute.xlu0 %596 }
 0x83b   :  { %v599_v50 = vmul.f32 %v597_v48, %v594_v46 }
 0x83d   :  { %v1864_v51 = vadd.f32 %v600_v49, %v599_v50 }
 0x83f   :  { %632 = vrot.lane.b32.xlu1 %v1864_v51, %s1632_s2 }
 0x893   :  { %v629_v47 = vpop.permute.xlu0 %628 }
 0x897   :  { %v281_v4 = vpop.permute.xlu0 %280 }
 0x898   :  { %v307_v5 = vmul.f32 %v281_v4, %v1728_v39 }
 0x89a   :  { %v315_v6 = vadd.f32 %v307_v5, %v1726_v38 }
 0x8b1   :  { %v1868_v59 = vpop.permute.xlu1 %632 }
 0x8b2   :  { %v635_v60 = vsel %vm115_vm0, %v629_v47, %v1868_v59 }
 0x8b3   :  { %1476 = vmatmul.mubr.msk.f32.vlgmr.msra.gmra.mxu0 %vm126_vm8, %v635_v60 }
 0x8b4   :  { %940 = vmatpush1.msra.mxu0 %v1742_v53  ;;  %979 = vmatprep.mubr.f32.mxu0 %v1627_v0 }
 0x8b5   :  { %941 = vmatprep.subr.mxu0 %v1747_v54 }
 0x8b6   :  { %942 = vmatpush1.msra.mxu0 %v1753_v55 }
 0x8b7   :  { %943 = vmatprep.subr.mxu0 %v1760_v56 }
 0x8b8   :  { %944 = vmatpush1.msra.mxu0 %v1767_v57 }
 0x8b9   :  { %945 = vmatprep.subr.mxu0 %v1774_v58 }
 0x8ba   :  { %946 = vmatpush1.msra.mxu0 %v1789_v62 }
 0x8bb   :  { %1215 = vmatprep.subr.mxu0 %v1737_v52 }
 0x973   :  { %v705_v63 = vpop.f32.mrf.mxu0 }
 0x974   :  { %v706_v1 = vadd.f32 %v705_v63, %v1710_v28 }
 0x975   :  { %v707_v2 = vpop.f32.mrf.mxu0 }
 0x976   :  { %v708_v3 = vadd.f32 %v707_v2, %v1811_v8  ;;  %711 = vrot.lane.b32.xlu1 %v706_v1, %s1632_s2  ;;  %v740_v9 = vadd.f32 %v706_v1, %v315_v6 }
 0x978   :  { %722 = vrot.lane.b32.xlu0 %v708_v3, %s1633_s26  ;;  %v1478_v10 = vmul.f32 -1.442695, %v740_v9 }
 0x97a   :  { %747 = vrot.lane.b32.xlu1 %v706_v1, %s1629_s5  ;;  %1561 = vpow2.f32 %v1478_v10 }
 0x987   :  { %v1562_v11 = vpop.eup %1561 }
 0x988   :  { %v744_v12 = vadd.f32 1.0, %v1562_v11 }
 0x98a   :  { %1563 = vrcp.f32 %v744_v12 }
 0x997   :  { %v1564_v16 = vpop.eup %1563 }
 0x998   :  { %v757_v33 = vsub.f32 1.0, %v1564_v16  ;;  %v763_v36 = vmul.f32 %v1564_v16, %v1857_v43 }
 0x9e8   :  { %v712_v13 = vpop.permute.xlu1 %711 }
 0x9e9   :  { %v714_v14 = vadd.f32 %v712_v13, %v706_v1 }
 0x9ea   :  { %v723_v23 = vpop.permute.xlu0 %722 }
 0x9eb   :  { %v1477_v15 = vmul.f32 -1.442695, %v714_v14 }
 0x9ec   :  { %v748_v18 = vpop.permute.xlu1 %747 }
 0x9ed   :  { %1565 = vpow2.f32 %v1477_v15  ;;  %v750_v19 = vmul.f32 %v1564_v16, %v748_v18 }
 0x9ef   :  { %752 = vrot.lane.b32.xlu1 %v750_v19, %s1630_s10 }
 0x9fa   :  { %v1566_v20 = vpop.eup %1565 }
 0x9fb   :  { %v718_v21 = vadd.f32 1.0, %v1566_v20 }
 0x9fd   :  { %1567 = vrcp.f32 %v718_v21 }
 0xa0a   :  { %v1568_v22 = vpop.eup %1567 }
 0xa0b   :  { %v725_v24 = vmul.f32 %v1568_v22, %v723_v23  ;;  %v732_v44 = vsub.f32 1.0, %v1568_v22  ;;  %v738_v46 = vmul.f32 %v1568_v22, %v1864_v51 }
 0xa0d   :  { %727 = vrot.lane.b32.xlu0 %v725_v24, %s1630_s10 }
 0xa61   :  { %v753_v26 = vpop.permute.xlu1 %752 }
 0xa62   :  { %v755_v27 = vadd.f32 %v753_v26, %v315_v6 }
 0xa64   :  { %1569 = vtanh.f32 %v755_v27 }
 0xa71   :  { %v1570_v29 = vpop.eup %1569 }
 0xa72   :  { %759 = vrot.lane.b32.xlu1 %v1570_v29, %s1631_s24 }
 0xa7f   :  { %v728_v30 = vpop.permute.xlu0 %727 }
 0xa80   :  { %v730_v31 = vadd.f32 %v728_v30, %v706_v1 }
 0xa82   :  { %1571 = vtanh.f32 %v730_v31 }
 0xa8f   :  { %v1572_v32 = vpop.eup %1571 }
 0xa90   :  { %734 = vrot.lane.b32.xlu0 %v1572_v32, %s1631_s24 }
 0xae4   :  { %v760_v34 = vpop.permute.xlu1 %759 }
 0xae5   :  { %v762_v37 = vmul.f32 %v760_v34, %v757_v33 }
 0xae7   :  { %v1894_v40 = vadd.f32 %v763_v36, %v762_v37  ;;  %v263_v36 = vsub.s32 2, %v1698_v17 }
 0xae9   :  { %766 = vrot.lane.b32.xlu0 %v1894_v40, %s1631_s24  ;;  %v264_v37 = vrot.slane %v1720_v35, %v263_v36 }
 0xaed   :  { %273 = vbcast.lane.b32.xlu0 %v271_v42, 256 }
 0xb02   :  { %v735_v45 = vpop.permute.xlu0 %734 }
 0xb03   :  { %v737_v48 = vmul.f32 %v735_v45, %v732_v44 }
 0xb05   :  { %v1901_v49 = vadd.f32 %v738_v46, %v737_v48 }
 0xb07   :  { %770 = vrot.lane.b32.xlu1 %v1901_v49, %s1632_s2 }
 0xb5b   :  { %v767_v43 = vpop.permute.xlu0 %766 }
 0xb5f   :  { %v274_v2 = vpop.permute.xlu0 %273 }
 0xb60   :  { %v306_v3 = vmul.f32 %v274_v2, %v1728_v39 }
 0xb62   :  { %v314_v4 = vadd.f32 %v306_v3, %v1726_v38 }
 0xb79   :  { %v771_v50 = vpop.permute.xlu1 %770 }
 0xb7a   :  { %v773_v47 = vsel %vm115_vm0, %v767_v43, %v771_v50 }
 0xb7b   :  { %1479 = vmatmul.mubr.msk.f32.vlgmr.msra.gmra.mxu1 %vm126_vm8, %v773_v47 }
 0xb7c   :  { %1078 = vmatpush1.msra.mxu1 %v1742_v53  ;;  %1117 = vmatprep.mubr.f32.mxu1 %v1627_v0 }
 0xb7d   :  { %1079 = vmatprep.subr.mxu1 %v1747_v54 }
 0xb7e   :  { %1080 = vmatpush1.msra.mxu1 %v1753_v55 }
 0xb7f   :  { %1081 = vmatprep.subr.mxu1 %v1760_v56 }
 0xb80   :  { %1082 = vmatpush1.msra.mxu1 %v1767_v57 }
 0xb81   :  { %1083 = vmatprep.subr.mxu1 %v1774_v58 }
 0xb82   :  { %1084 = vmatpush1.msra.mxu1 %v1789_v62 }
 0xb83   :  { %1353 = vmatprep.subr.mxu1 %v1737_v52 }
 0xc3b   :  { %v843_v51 = vpop.f32.mrf.mxu1 }
 0xc3c   :  { %v844_v60 = vadd.f32 %v843_v51, %v1710_v28 }
 0xc3d   :  { %v845_v63 = vpop.f32.mrf.mxu1 }
 0xc3e   :  { %v846_v1 = vadd.f32 %v845_v63, %v1811_v8  ;;  %849 = vrot.lane.b32.xlu1 %v844_v60, %s1632_s2  ;;  %v878_v5 = vadd.f32 %v844_v60, %v314_v4 }
 0xc40   :  { %860 = vrot.lane.b32.xlu0 %v846_v1, %s1633_s26  ;;  %v1481_v6 = vmul.f32 -1.442695, %v878_v5 }
 0xc42   :  { %885 = vrot.lane.b32.xlu1 %v844_v60, %s1629_s5  ;;  %1573 = vpow2.f32 %v1481_v6 }
 0xc4f   :  { %v1574_v52 = vpop.eup %1573 }
 0xc50   :  { %v882_v9 = vadd.f32 1.0, %v1574_v52 }
 0xc52   :  { %1575 = vrcp.f32 %v882_v9 }
 0xc5f   :  { %v1576_v13 = vpop.eup %1575 }
 0xc60   :  { %v895_v30 = vsub.f32 1.0, %v1576_v13  ;;  %v901_v32 = vmul.f32 %v1576_v13, %v1894_v40 }
 0xcb0   :  { %v850_v10 = vpop.permute.xlu1 %849 }
 0xcb1   :  { %v852_v11 = vadd.f32 %v850_v10, %v844_v60 }
 0xcb2   :  { %v861_v20 = vpop.permute.xlu0 %860 }
 0xcb3   :  { %v1480_v12 = vmul.f32 -1.442695, %v852_v11 }
 0xcb4   :  { %v886_v14 = vpop.permute.xlu1 %885 }
 0xcb5   :  { %1577 = vpow2.f32 %v1480_v12  ;;  %v888_v15 = vmul.f32 %v1576_v13, %v886_v14 }
 0xcb7   :  { %890 = vrot.lane.b32.xlu1 %v888_v15, %s1630_s10 }
 0xcc2   :  { %v1578_v16 = vpop.eup %1577 }
 0xcc3   :  { %v856_v18 = vadd.f32 1.0, %v1578_v16 }
 0xcc5   :  { %1579 = vrcp.f32 %v856_v18 }
 0xcd2   :  { %v1580_v19 = vpop.eup %1579 }
 0xcd3   :  { %v863_v21 = vmul.f32 %v1580_v19, %v861_v20  ;;  %v870_v41 = vsub.f32 1.0, %v1580_v19  ;;  %v876_v44 = vmul.f32 %v1580_v19, %v1901_v49 }
 0xcd5   :  { %865 = vrot.lane.b32.xlu0 %v863_v21, %s1630_s10 }
 0xd29   :  { %v891_v22 = vpop.permute.xlu1 %890 }
 0xd2a   :  { %v893_v23 = vadd.f32 %v891_v22, %v314_v4 }
 0xd2c   :  { %1581 = vtanh.f32 %v893_v23 }
 0xd39   :  { %v1582_v24 = vpop.eup %1581 }
 0xd3a   :  { %897 = vrot.lane.b32.xlu1 %v1582_v24, %s1631_s24 }
 0xd47   :  { %v866_v26 = vpop.permute.xlu0 %865 }
 0xd48   :  { %v868_v27 = vadd.f32 %v866_v26, %v844_v60 }
 0xd4a   :  { %1583 = vtanh.f32 %v868_v27 }
 0xd57   :  { %v1584_v29 = vpop.eup %1583 }
 0xd58   :  { %872 = vrot.lane.b32.xlu0 %v1584_v29, %s1631_s24 }
 0xdac   :  { %v898_v31 = vpop.permute.xlu1 %897 }
 0xdad   :  { %v900_v33 = vmul.f32 %v898_v31, %v895_v30 }
 0xdaf   :  { %v1928_v34 = vadd.f32 %v901_v32, %v900_v33  ;;  %v257_v33 = vrot.slane %v1720_v35, %v256_v7 }
 0xdb1   :  { %904 = vrot.lane.b32.xlu0 %v1928_v34, %s1631_s24 }
 0xdb5   :  { %266 = vbcast.lane.b32.xlu0 %v264_v37, 256 }
 0xdca   :  { %v873_v42 = vpop.permute.xlu0 %872 }
 0xdcb   :  { %v875_v45 = vmul.f32 %v873_v42, %v870_v41 }
 0xdcd   :  { %v1935_v46 = vadd.f32 %v876_v44, %v875_v45 }
 0xdcf   :  { %908 = vrot.lane.b32.xlu1 %v1935_v46, %s1632_s2 }
 0xe23   :  { %v905_v40 = vpop.permute.xlu0 %904 }
 0xe27   :  { %v267_v63 = vpop.permute.xlu0 %266 }
 0xe28   :  { %v305_v1 = vmul.f32 %v267_v63, %v1728_v39 }
 0xe2a   :  { %v313_v2 = vadd.f32 %v305_v1, %v1726_v38 }
 0xe41   :  { %v909_v48 = vpop.permute.xlu1 %908 }
 0xe42   :  { %v911_v43 = vsel %vm115_vm0, %v905_v40, %v909_v48 }
 0xe43   :  { %1482 = vmatmul.mubr.msk.f32.vlgmr.msra.gmra.mxu0 %vm126_vm8, %v911_v43 }
 0xe44   :  { %1216 = vmatpush1.msra.mxu0 %v1742_v53  ;;  %1255 = vmatprep.mubr.f32.mxu0 %v1627_v0 }
 0xe45   :  { %1217 = vmatprep.subr.mxu0 %v1747_v54 }
 0xe46   :  { %1218 = vmatpush1.msra.mxu0 %v1753_v55 }
 0xe47   :  { %1219 = vmatprep.subr.mxu0 %v1760_v56 }
 0xe48   :  { %1220 = vmatpush1.msra.mxu0 %v1767_v57 }
 0xe49   :  { %1221 = vmatprep.subr.mxu0 %v1774_v58 }
 0xe4a   :  { %1222 = vmatpush1.msra.mxu0 %v1789_v62 }
 0xf03   :  { %v981_v50 = vpop.f32.mrf.mxu0 }
 0xf04   :  { %v982_v47 = vadd.f32 %v981_v50, %v1710_v28 }
 0xf05   :  { %v983_v51 = vpop.f32.mrf.mxu0 }
 0xf06   :  { %v984_v60 = vadd.f32 %v983_v51, %v1811_v8  ;;  %987 = vrot.lane.b32.xlu1 %v982_v47, %s1632_s2  ;;  %v1016_v3 = vadd.f32 %v982_v47, %v313_v2 }
 0xf08   :  { %998 = vrot.lane.b32.xlu0 %v984_v60, %s1633_s26  ;;  %v1484_v4 = vmul.f32 -1.442695, %v1016_v3 }
 0xf0a   :  { %1023 = vrot.lane.b32.xlu1 %v982_v47, %s1629_s5  ;;  %1585 = vpow2.f32 %v1484_v4 }
 0xf17   :  { %v1586_v5 = vpop.eup %1585 }
 0xf18   :  { %v1020_v6 = vadd.f32 1.0, %v1586_v5 }
 0xf1a   :  { %1587 = vrcp.f32 %v1020_v6 }
 0xf27   :  { %v1588_v11 = vpop.eup %1587 }
 0xf28   :  { %v1033_v27 = vsub.f32 1.0, %v1588_v11  ;;  %v1039_v30 = vmul.f32 %v1588_v11, %v1928_v34 }
 0xf78   :  { %v988_v52 = vpop.permute.xlu1 %987 }
 0xf79   :  { %v990_v9 = vadd.f32 %v988_v52, %v982_v47 }
 0xf7a   :  { %v999_v18 = vpop.permute.xlu0 %998 }
 0xf7b   :  { %v1483_v10 = vmul.f32 -1.442695, %v990_v9 }
 0xf7c   :  { %v1024_v12 = vpop.permute.xlu1 %1023 }
 0xf7d   :  { %1589 = vpow2.f32 %v1483_v10  ;;  %v1026_v13 = vmul.f32 %v1588_v11, %v1024_v12 }
 0xf7f   :  { %1028 = vrot.lane.b32.xlu1 %v1026_v13, %s1630_s10 }
 0xf8a   :  { %v1590_v14 = vpop.eup %1589 }
 0xf8b   :  { %v994_v15 = vadd.f32 1.0, %v1590_v14 }
 0xf8d   :  { %1591 = vrcp.f32 %v994_v15 }
 0xf9a   :  { %v1592_v16 = vpop.eup %1591 }
 0xf9b   :  { %v1001_v19 = vmul.f32 %v1592_v16, %v999_v18  ;;  %v1008_v36 = vsub.f32 1.0, %v1592_v16  ;;  %v1014_v41 = vmul.f32 %v1592_v16, %v1935_v46 }
 0xf9d   :  { %1003 = vrot.lane.b32.xlu0 %v1001_v19, %s1630_s10 }
 0xff1   :  { %v1029_v20 = vpop.permute.xlu1 %1028 }
 0xff2   :  { %v1031_v21 = vadd.f32 %v1029_v20, %v313_v2  ;;  %v250_v20 = vrot.slane %v1720_v35, %v249_v25 }
 0xff4   :  { %1593 = vtanh.f32 %v1031_v21 }
0x1001   :  { %v1594_v22 = vpop.eup %1593 }
0x1002   :  { %1035 = vrot.lane.b32.xlu1 %v1594_v22, %s1631_s24 }
0x100f   :  { %v1004_v23 = vpop.permute.xlu0 %1003 }
0x1010   :  { %v1006_v24 = vadd.f32 %v1004_v23, %v982_v47 }
0x1012   :  { %1595 = vtanh.f32 %v1006_v24 }
0x101f   :  { %v1596_v26 = vpop.eup %1595 }
0x1020   :  { %1010 = vrot.lane.b32.xlu0 %v1596_v26, %s1631_s24 }
0x1074   :  { %v1036_v29 = vpop.permute.xlu1 %1035 }
0x1075   :  { %v1038_v31 = vmul.f32 %v1036_v29, %v1033_v27 }
0x1077   :  { %v1961_v32 = vadd.f32 %v1039_v30, %v1038_v31 }
0x1079   :  { %1042 = vrot.lane.b32.xlu0 %v1961_v32, %s1631_s24 }
0x107d   :  { %259 = vbcast.lane.b32.xlu0 %v257_v33, 256 }
0x1092   :  { %v1011_v37 = vpop.permute.xlu0 %1010 }
0x1093   :  { %v1013_v42 = vmul.f32 %v1011_v37, %v1008_v36 }
0x1095   :  { %v1969_v44 = vadd.f32 %v1014_v41, %v1013_v42 }
0x1097   :  { %1046 = vrot.lane.b32.xlu1 %v1969_v44, %s1632_s2 }
0x10eb   :  { %v1043_v34 = vpop.permute.xlu0 %1042 }
0x1109   :  { %v1047_v45 = vpop.permute.xlu1 %1046 }
0x110a   :  { %v1049_v40 = vsel %vm115_vm0, %v1043_v34, %v1047_v45 }
0x110b   :  { %1485 = vmatmul.mubr.msk.f32.vlgmr.msra.gmra.mxu1 %vm126_vm8, %v1049_v40 }
0x110c   :  { %1354 = vmatpush1.msra.mxu1 %v1742_v53  ;;  %1393 = vmatprep.mubr.f32.mxu1 %v1627_v0  ;;  %v260_v0 = vpop.permute.xlu0 %259 }
0x110d   :  { %1355 = vmatprep.subr.mxu1 %v1747_v54  ;;  %v304_v54 = vmul.f32 %v260_v0, %v1728_v39 }
0x110e   :  { %1356 = vmatpush1.msra.mxu1 %v1753_v55 }
0x110f   :  { %1357 = vmatprep.subr.mxu1 %v1760_v56  ;;  %v312_v55 = vadd.f32 %v304_v54, %v1726_v38 }
0x1110   :  { %1358 = vmatpush1.msra.mxu1 %v1767_v57 }
0x1111   :  { %1359 = vmatprep.subr.mxu1 %v1774_v58 }
0x1112   :  { %1360 = vmatpush1.msra.mxu1 %v1789_v62 }
0x11cb   :  { %v1119_v7 = vpop.f32.mrf.mxu1 }
0x11cc   :  { %v1120_v48 = vadd.f32 %v1119_v7, %v1710_v28 }
0x11cd   :  { %v1121_v43 = vpop.f32.mrf.mxu1 }
0x11ce   :  { %v1122_v53 = vadd.f32 %v1121_v43, %v1811_v8  ;;  %1125 = vrot.lane.b32.xlu1 %v1120_v48, %s1632_s2  ;;  %v1154_v56 = vadd.f32 %v1120_v48, %v312_v55 }
0x11d0   :  { %1136 = vrot.lane.b32.xlu0 %v1122_v53, %s1633_s26  ;;  %v1487_v57 = vmul.f32 -1.442695, %v1154_v56 }
0x11d2   :  { %1161 = vrot.lane.b32.xlu1 %v1120_v48, %s1629_s5  ;;  %1597 = vpow2.f32 %v1487_v57 }
0x11df   :  { %v1598_v58 = vpop.eup %1597 }
0x11e0   :  { %v1158_v62 = vadd.f32 1.0, %v1598_v58 }
0x11e2   :  { %1599 = vrcp.f32 %v1158_v62 }
0x11ef   :  { %v1600_v60 = vpop.eup %1599 }
0x11f0   :  { %v1171_v14 = vsub.f32 1.0, %v1600_v60  ;;  %v1177_v16 = vmul.f32 %v1600_v60, %v1961_v32 }
0x1240   :  { %v1126_v50 = vpop.permute.xlu1 %1125 }
0x1241   :  { %v1128_v47 = vadd.f32 %v1126_v50, %v1120_v48 }
0x1242   :  { %v1137_v5 = vpop.permute.xlu0 %1136 }
0x1243   :  { %v1486_v51 = vmul.f32 -1.442695, %v1128_v47 }
0x1244   :  { %v1162_v63 = vpop.permute.xlu1 %1161 }
0x1245   :  { %1601 = vpow2.f32 %v1486_v51  ;;  %v1164_v1 = vmul.f32 %v1600_v60, %v1162_v63 }
0x1247   :  { %1166 = vrot.lane.b32.xlu1 %v1164_v1, %s1630_s10 }
0x1252   :  { %v1602_v2 = vpop.eup %1601 }
0x1253   :  { %v1132_v3 = vadd.f32 1.0, %v1602_v2 }
0x1255   :  { %1603 = vrcp.f32 %v1132_v3 }
0x1262   :  { %v1604_v4 = vpop.eup %1603 }
0x1263   :  { %v1139_v6 = vmul.f32 %v1604_v4, %v1137_v5  ;;  %v1146_v21 = vsub.f32 1.0, %v1604_v4  ;;  %v1152_v23 = vmul.f32 %v1604_v4, %v1969_v44 }
0x1265   :  { %1141 = vrot.lane.b32.xlu0 %v1139_v6, %s1630_s10 }
0x12b9   :  { %v1167_v52 = vpop.permute.xlu1 %1166 }
0x12ba   :  { %v1169_v9 = vadd.f32 %v1167_v52, %v312_v55 }
0x12bc   :  { %1605 = vtanh.f32 %v1169_v9 }
0x12c9   :  { %v1606_v10 = vpop.eup %1605 }
0x12ca   :  { %1173 = vrot.lane.b32.xlu1 %v1606_v10, %s1631_s24 }
0x12d7   :  { %v1142_v11 = vpop.permute.xlu0 %1141 }
0x12d8   :  { %v1144_v12 = vadd.f32 %v1142_v11, %v1120_v48 }
0x12da   :  { %1607 = vtanh.f32 %v1144_v12 }
0x12e7   :  { %v1608_v13 = vpop.eup %1607 }
0x12e8   :  { %1148 = vrot.lane.b32.xlu0 %v1608_v13, %s1631_s24 }
0x133c   :  { %v1174_v15 = vpop.permute.xlu1 %1173 }
0x133d   :  { %v1176_v18 = vmul.f32 %v1174_v15, %v1171_v14 }
0x133f   :  { %v1178_v19 = vadd.f32 %v1177_v16, %v1176_v18 }
0x1341   :  { %1180 = vrot.lane.b32.xlu0 %v1178_v19, %s1631_s24 }
0x1345   :  { %252 = vbcast.lane.b32.xlu0 %v250_v20, 256 }
0x135a   :  { %v1149_v22 = vpop.permute.xlu0 %1148 }
0x135b   :  { %v1151_v24 = vmul.f32 %v1149_v22, %v1146_v21 }
0x135d   :  { %v2000_v26 = vadd.f32 %v1152_v23, %v1151_v24 }
0x135f   :  { %1184 = vrot.lane.b32.xlu1 %v2000_v26, %s1632_s2 }
0x13b3   :  { %v1181_v27 = vpop.permute.xlu0 %1180 }
0x13b7   :  { %v253_v32 = vpop.permute.xlu0 %252 }
0x13b8   :  { %v303_v33 = vmul.f32 %v253_v32, %v1728_v39 }
0x13ba   :  { %v311_v36 = vadd.f32 %v303_v33, %v1726_v38 }
0x13d1   :  { %v1185_v29 = vpop.permute.xlu1 %1184 }
0x13d2   :  { %v1187_v30 = vsel %vm115_vm0, %v1181_v27, %v1185_v29 }
0x13d3   :  { %1488 = vmatmul.mubr.msk.f32.vlgmr.msra.gmra.mxu0 %vm126_vm8, %v1187_v30 }
0x1493   :  { %v1257_v17 = vpop.f32.mrf.mxu0 }
0x1494   :  { %v1258_v25 = vadd.f32 %v1257_v17, %v1710_v28 }
0x1495   :  { %v1259_v35 = vpop.f32.mrf.mxu0 }
0x1496   :  { %v1260_v31 = vadd.f32 %v1259_v35, %v1811_v8  ;;  %1263 = vrot.lane.b32.xlu1 %v1258_v25, %s1632_s2  ;;  %v1292_v37 = vadd.f32 %v1258_v25, %v311_v36 }
0x1498   :  { %1274 = vrot.lane.b32.xlu0 %v1260_v31, %s1633_s26  ;;  %v1490_v41 = vmul.f32 -1.442695, %v1292_v37 }
0x149a   :  { %1299 = vrot.lane.b32.xlu1 %v1258_v25, %s1629_s5  ;;  %1609 = vpow2.f32 %v1490_v41 }
0x14a7   :  { %v1610_v42 = vpop.eup %1609 }
0x14a8   :  { %v1296_v34 = vadd.f32 1.0, %v1610_v42 }
0x14aa   :  { %1611 = vrcp.f32 %v1296_v34 }
0x14b7   :  { %v1612_v48 = vpop.eup %1611 }
0x14b8   :  { %v1309_v51 = vsub.f32 1.0, %v1612_v48  ;;  %v1315_v63 = vmul.f32 %v1612_v48, %v1178_v19 }
0x1508   :  { %v1264_v45 = vpop.permute.xlu1 %1263 }
0x1509   :  { %v1266_v40 = vadd.f32 %v1264_v45, %v1258_v25 }
0x150a   :  { %v1275_v38 = vpop.permute.xlu0 %1274 }
0x150b   :  { %v1489_v7 = vmul.f32 -1.442695, %v1266_v40 }
0x150c   :  { %v1300_v43 = vpop.permute.xlu1 %1299 }
0x150d   :  { %1613 = vpow2.f32 %v1489_v7  ;;  %v1302_v53 = vmul.f32 %v1612_v48, %v1300_v43 }
0x150f   :  { %1304 = vrot.lane.b32.xlu1 %v1302_v53, %s1630_s10 }
0x151a   :  { %v1614_v0 = vpop.eup %1613 }
0x151b   :  { %v1270_v54 = vadd.f32 1.0, %v1614_v0 }
0x151d   :  { %1615 = vrcp.f32 %v1270_v54 }
0x152a   :  { %v1616_v39 = vpop.eup %1615 }
0x152b   :  { %v1277_v55 = vmul.f32 %v1616_v39, %v1275_v38  ;;  %v1284_v3 = vsub.f32 1.0, %v1616_v39  ;;  %v1290_v5 = vmul.f32 %v1616_v39, %v2000_v26 }
0x152d   :  { %1279 = vrot.lane.b32.xlu0 %v1277_v55, %s1630_s10 }
0x1581   :  { %v1305_v56 = vpop.permute.xlu1 %1304 }
0x1582   :  { %v1307_v57 = vadd.f32 %v1305_v56, %v311_v36 }
0x1584   :  { %1617 = vtanh.f32 %v1307_v57 }
0x1591   :  { %v1618_v58 = vpop.eup %1617 }
0x1592   :  { %1311 = vrot.lane.b32.xlu1 %v1618_v58, %s1631_s24 }
0x159f   :  { %v1280_v62 = vpop.permute.xlu0 %1279 }
0x15a0   :  { %v1282_v50 = vadd.f32 %v1280_v62, %v1258_v25 }
0x15a2   :  { %1619 = vtanh.f32 %v1282_v50 }
0x15af   :  { %v1620_v47 = vpop.eup %1619 }
0x15b0   :  { %1286 = vrot.lane.b32.xlu0 %v1620_v47, %s1631_s24 }
0x1604   :  { %v1312_v60 = vpop.permute.xlu1 %1311 }
0x1605   :  { %v1314_v1 = vmul.f32 %v1312_v60, %v1309_v51 }
0x1607   :  { %v1316_v2 = vadd.f32 %v1315_v63, %v1314_v1 }
0x1609   :  { %1318 = vrot.lane.b32.xlu0 %v1316_v2, %s1631_s24 }
0x1622   :  { %v1287_v4 = vpop.permute.xlu0 %1286 }
0x1623   :  { %v1289_v6 = vmul.f32 %v1287_v4, %v1284_v3 }
0x1625   :  { %v1291_v52 = vadd.f32 %v1290_v5, %v1289_v6 }
0x1627   :  { %1322 = vrot.lane.b32.xlu1 %v1291_v52, %s1632_s2 }
0x167b   :  { %v1319_v9 = vpop.permute.xlu0 %1318 }
0x1699   :  { %v1323_v10 = vpop.permute.xlu1 %1322 }
0x169a   :  { %v1325_v11 = vsel %vm115_vm0, %v1319_v9, %v1323_v10 }
0x169b   :  { %1491 = vmatmul.mubr.msk.f32.vlgmr.msra.gmra.mxu1 %vm126_vm8, %v1325_v11 }
0x175b   :  { %v1395_v12 = vpop.f32.mrf.mxu1 }
0x175c   :  { %v1396_v13 = vadd.f32 %v1395_v12, %v1710_v28 }
0x175d   :  { %v1397_v14 = vpop.f32.mrf.mxu1 }
0x175e   :  { %v1398_v15 = vadd.f32 %v1397_v14, %v1811_v8  ;;  %1401 = vrot.lane.b32.xlu0 %v1396_v13, %s1632_s2 }
0x1760   :  { %1412 = vrot.lane.b32.xlu1 %v1398_v15, %s1633_s26 }
0x17d0   :  { %v1402_v16 = vpop.permute.xlu0 %1401 }
0x17d1   :  { %v1404_v18 = vadd.f32 %v1402_v16, %v1396_v13 }
0x17d2   :  { %v1413_v23 = vpop.permute.xlu1 %1412 }
0x17d3   :  { %v1492_v19 = vmul.f32 -1.442695, %v1404_v18 }
0x17d5   :  { %1621 = vpow2.f32 %v1492_v19 }
0x17e2   :  { %v1622_v20 = vpop.eup %1621 }
0x17e3   :  { %v1408_v21 = vadd.f32 1.0, %v1622_v20 }
0x17e5   :  { %1623 = vrcp.f32 %v1408_v21 }
0x17f2   :  { %v1624_v22 = vpop.eup %1623 }
0x17f3   :  { %v1415_v24 = vmul.f32 %v1624_v22, %v1413_v23  ;;  %v1422_v29 = vsub.f32 1.0, %v1624_v22 }
0x17f5   :  { %1417 = vrot.lane.b32.xlu0 %v1415_v24, %s1630_s10 }
0x17f9   :  { %1430 = vrot.lane.b32.xlu0 %v1830_v61, %s1634_s27  ;;  %v1428_v61 = vmul.f32 %v1624_v22, %v1291_v52 }
0x17fd   :  { %1436 = vrot.lane.b32.xlu0 %v1935_v46, %s1631_s24 }
0x1801   :  { %1442 = vrot.lane.b32.xlu0 %v1291_v52, %s1630_s10 }
0x1867   :  { %v1418_v28 = vpop.permute.xlu0 %1417 }
0x1868   :  { %v1420_v8 = vadd.f32 %v1418_v28, %v1396_v13 }
0x186a   :  { %1625 = vtanh.f32 %v1420_v8 }
0x186b   :  { %v1431_v46 = vpop.permute.xlu0 %1430 }
0x186c   :  { %v1449_v31 = vsel %vm115_vm0, %v1431_v46, %v1868_v59 }
0x186f   :  { %v1437_v33 = vpop.permute.xlu0 %1436 }
0x1873   :  { %v1443_v41 = vpop.permute.xlu0 %1442 }
0x1877   :  { %v1626_v27 = vpop.eup %1625 }
0x1878   :  { %1424 = vrot.lane.b32.xlu1 %v1626_v27, %s1631_s24 }
0x187c   :  { %1433 = vrot.lane.b32.xlu1 %v1901_v49, %s1629_s5 }
0x1880   :  { %1439 = vrot.lane.b32.xlu1 %v2000_v26, %s1635_s28 }
0x18ea   :  { %v1425_v30 = vpop.permute.xlu1 %1424 }
0x18eb   :  { %v1427_v17 = vmul.f32 %v1425_v30, %v1422_v29 }
0x18ed   :  { %v1429_v25 = vadd.f32 %v1428_v61, %v1427_v17 }
0x18ee   :  { %v1434_v35 = vpop.permute.xlu1 %1433 }
0x18ef   :  { %1446 = vrot.lane.b32.xlu1 %v1429_v25, %s1633_s26  ;;  %v1450_v32 = vsel %vm126_vm8, %v1449_v31, %v1434_v35 }
0x18f0   :  { %v1452_v49 = vsel %vm1451_vm9, %v1450_v32, %v1437_v33 }
0x18f1   :  { %v1454_v36 = vsel %vm1453_vm10, %v1452_v49, %v1969_v44 }
0x18f2   :  { %v1440_v26 = vpop.permute.xlu1 %1439 }
0x18f3   :  { %v1456_v37 = vsel %vm1455_vm11, %v1454_v36, %v1440_v26 }
0x18f4   :  { %v1458_v34 = vsel %vm1457_vm12, %v1456_v37, %v1443_v41 }
0x1961   :  { %v1447_v42 = vpop.permute.xlu1 %1446 }
0x1962   :  { %v1460_v45 = vsel %vm1459_vm13, %v1458_v34, %v1447_v42 }
0x1963   :  { %1461 = vst [vmem:[%s2046_s3] sm:$0x3] %v1460_v45 }

</bundles_post_ra>
